<compile_context>
chip_gen: v6e
topology: v6e:2x2x1
jax: 0.10.0
libtpu: 0.0.40
codegen_flags: <defaults>
</compile_context>

<pallas_src>
import math

import jax
import jax.numpy as jnp
from jax import lax
from jax.experimental import pallas as pl
from jax.experimental.pallas import tpu as pltpu

HIDDEN = 64              # config.hidden_size == input_size
NUM_HEADS = 4            # config.num_attention_heads
HEAD_DIM = HIDDEN // NUM_HEADS
CTX_DIM = 768            # ctx_dim=768 hard-coded in NodeDistReg
LN_EPS = 1e-12


def _layer_norm(h, gamma, beta):
    # BertLayerNorm: biased variance over last axis, eps inside rsqrt.
    mu = jnp.mean(h, axis=-1, keepdims=True)
    var = jnp.mean(jnp.square(h - mu), axis=-1, keepdims=True)
    return gamma * (h - mu) * lax.rsqrt(var + LN_EPS) + beta


def _node_dist_reg_kernel(
    x_ref, ctx_ref,
    wq_ref, bq_ref, wkv_ref, bkv_ref,
    wo_ref, bo_ref, go_ref, boln_ref,
    wf1_ref, bf1_ref, gf_ref, bfln_ref, wf2_ref, bf2_ref,
    wd1_ref, bd1_ref, gd_ref, bdln_ref, wd2_ref, bd2_ref,
    dist_ref, fuse_ref,
):
    Bb, Lq, H = x_ref.shape
    _, Lk, C = ctx_ref.shape

    x3 = x_ref[...]                              # (Bb, Lq, H)  f32
    xf = x3.reshape(Bb * Lq, H)                  # (Bb*Lq, H)
    ctxf = ctx_ref[...].reshape(Bb * Lk, C)      # (Bb*Lk, C)   bf16

    # --- BertOutAttention projections --------------------------------------
    scale = 1.0 / math.sqrt(HEAD_DIM)
    # Q projection, scale hoisted once (instead of per-head).
    q = (jnp.dot(xf, wq_ref[...], preferred_element_type=jnp.float32)
         + bq_ref[...]) * scale
    # Fused K||V projection: bf16 operands, f32 accumulation, 128-lane output.
    kv = (jnp.dot(ctxf, wkv_ref[...], preferred_element_type=jnp.float32)
          + bkv_ref[...])                         # (Bb*Lk, 2H) f32
    q3 = q.reshape(Bb, Lq, H)
    k3 = kv[:, :H].reshape(Bb, Lk, H)
    v3 = kv[:, H:].reshape(Bb, Lk, H)

    # --- attention: per-head loop, batched over Bb; accumulate straight into
    #     the BertSelfOutput dense projection (no concat of head outputs) -----
    dense = None
    for h in range(NUM_HEADS):                   # static unroll (4 heads)
        sl = slice(h * HEAD_DIM, (h + 1) * HEAD_DIM)
        qh, kh, vh = q3[:, :, sl], k3[:, :, sl], v3[:, :, sl]
        s = lax.dot_general(qh, kh, (((2,), (2,)), ((0,), (0,))),
                            preferred_element_type=jnp.float32)   # (Bb,Lq,Lk)
        s = s - jnp.max(s, axis=-1, keepdims=True)
        e = jnp.exp(s)
        p = e * pl.reciprocal(jnp.sum(e, axis=-1, keepdims=True), approx=True)
        oh = lax.dot_general(p, vh, (((2,), (1,)), ((0,), (0,))),
                             preferred_element_type=jnp.float32)  # (Bb,Lq,hd)
        contrib = jnp.dot(oh.reshape(Bb * Lq, HEAD_DIM), wo_ref[sl, :],
                          preferred_element_type=jnp.float32)     # (Bb*Lq,H)
        dense = contrib if dense is None else dense + contrib
    dense = dense + bo_ref[...]

    # --- BertSelfOutput: residual + LayerNorm -------------------------------
    attn = _layer_norm(dense + xf, go_ref[...], boln_ref[...])    # (Bb*Lq, H)

    # --- dist_sap_head = ClsPrediction(H): Linear->ReLU->LN->Linear(H,1) ----
    hd = (jnp.dot(attn, wd1_ref[...], preferred_element_type=jnp.float32)
          + bd1_ref[...])
    hd = jnp.maximum(hd, 0.0)
    hd = _layer_norm(hd, gd_ref[...], bdln_ref[...])
    hd3 = hd.reshape(Bb, Lq, H)
    # N=1 head as VPU multiply + lane reduce; lane-dense (Bb, Lq) store.
    dist_ref[...] = jnp.sum(hd3 * wd2_ref[...], axis=-1) + bd2_ref[...]

    # --- dreamer_fuse_linear = ClsPrediction(H, 2H) on CLS tokens, sigmoid ---
    attn3 = attn.reshape(Bb, Lq, H)
    x_cls = x3[:, 0, :]                          # (Bb, H)
    a_cls = attn3[:, 0, :]                       # (Bb, H)
    # Split-weight form of concat([x_cls, a_cls]) @ wf1 (avoids the concat).
    hf = (jnp.dot(x_cls, wf1_ref[:H, :], preferred_element_type=jnp.float32)
          + jnp.dot(a_cls, wf1_ref[H:, :], preferred_element_type=jnp.float32)
          + bf1_ref[...])
    hf = jnp.maximum(hf, 0.0)
    hf = _layer_norm(hf, gf_ref[...], bfln_ref[...])
    logit = jnp.sum(hf * wf2_ref[...], axis=-1, keepdims=True) + bf2_ref[...]
    fuse_ref[...] = jax.nn.sigmoid(logit)


def init_params(key):
    """Deterministic synthetic parameters (no checkpoint)."""
    def lin(k, fin, fout, scale=0.02):
        kw, kb = jax.random.split(k)
        w = scale * jax.random.normal(kw, (fin, fout), jnp.float32)
        b = scale * jax.random.normal(kb, (1, fout), jnp.float32)
        return w, b

    ks = jax.random.split(key, 8)
    H = HIDDEN
    wq, bq = lin(ks[0], H, H)
    wk, bk = lin(ks[1], CTX_DIM, H)
    wv, bv = lin(ks[2], CTX_DIM, H)
    wo, bo = lin(ks[3], H, H)
    go, boln = jnp.ones((1, H), jnp.float32), jnp.zeros((1, H), jnp.float32)
    wf1, bf1 = lin(ks[4], 2 * H, H)
    gf, bfln = jnp.ones((1, H), jnp.float32), jnp.zeros((1, H), jnp.float32)
    wf2, bf2 = lin(ks[5], H, 1)
    wd1, bd1 = lin(ks[6], H, H)
    gd, bdln = jnp.ones((1, H), jnp.float32), jnp.zeros((1, H), jnp.float32)
    wd2, bd2 = lin(ks[7], H, 1)
    return (wq, bq, wk, bk, wv, bv, wo, bo, go, boln,
            wf1, bf1, gf, bfln, wf2, bf2,
            wd1, bd1, gd, bdln, wd2, bd2)


def _pick_b_blk(B, Lq, Lk):
    # Double-buffered x (f32) + ctx (bf16) blocks per grid step must fit a
    # conservative budget that works on every generation (v7x has only 64 MiB
    # physical VMEM / 32 MiB scoped default; v5e/v6e have 128 MiB).
    per_batch = 2 * (Lq * HIDDEN * 4 + Lk * CTX_DIM * 2)   # bytes, 2x buffered
    cap = max(1, (8 * 1024 * 1024) // per_batch)
    b_blk = 1
    for d in range(1, B + 1):
        if B % d == 0 and d <= cap:
            b_blk = d
    return b_blk


def _vmem_limit_bytes():
    # Explicit scoped-VMEM limit; 32 MiB is safe on v5e/v6e (128 MiB physical)
    # and on v7x (64 MiB physical).  Query hardware when available.
    try:
        info = pltpu.get_tpu_info()
        return int(min(32 * 1024 * 1024, info.vmem_capacity_bytes // 2))
    except Exception:
        return 32 * 1024 * 1024


def node_dist_reg(x, ins_img_features, params):
    B, Lq, H = x.shape
    _, Lk, C = ins_img_features.shape
    assert H == HIDDEN and C == CTX_DIM

    (wq, bq, wk, bk, wv, bv, wo, bo, go, boln,
     wf1, bf1, gf, bfln, wf2, bf2,
     wd1, bd1, gd, bdln, wd2, bd2) = params

    # Fuse K||V weights and cast the big operands to bf16 for the MXU (the
    # kernel requests f32 accumulation).  N=1 heads passed as (1, H) rows so
    # the kernel uses a VPU multiply + lane reduce instead of an MXU matmul.
    wkv = jnp.concatenate([wk, wv], axis=1).astype(jnp.bfloat16)   # (C, 2H)
    bkv = jnp.concatenate([bk, bv], axis=1)                        # (1, 2H)
    wf2r = jnp.transpose(wf2)                                      # (1, H)
    wd2r = jnp.transpose(wd2)                                      # (1, H)
    ctx_bf16 = ins_img_features.astype(jnp.bfloat16)

    kparams = (wq, bq, wkv, bkv, wo, bo, go, boln,
               wf1, bf1, gf, bfln, wf2r, bf2,
               wd1, bd1, gd, bdln, wd2r, bd2)

    b_blk = _pick_b_blk(B, Lq, Lk)
    grid = (B // b_blk,)

    def wspec(arr):
        nd = arr.ndim
        # Constant index_map: weights stay resident across grid steps.
        return pl.BlockSpec(arr.shape, lambda b, _nd=nd: (0,) * _nd)

    in_specs = [
        pl.BlockSpec((b_blk, Lq, H), lambda b: (b, 0, 0)),
        pl.BlockSpec((b_blk, Lk, C), lambda b: (b, 0, 0)),
    ] + [wspec(p) for p in kparams]

    out_specs = (
        pl.BlockSpec((b_blk, Lq), lambda b: (b, 0)),   # lane-dense dist logits
        pl.BlockSpec((b_blk, 1), lambda b: (b, 0)),    # fuse weight per batch
    )
    out_shape = (
        jax.ShapeDtypeStruct((B, Lq), jnp.float32),
        jax.ShapeDtypeStruct((B, 1), jnp.float32),
    )

    dist, fuse = pl.pallas_call(
        _node_dist_reg_kernel,
        out_shape=out_shape,
        grid_spec=pltpu.PrefetchScalarGridSpec(
            num_scalar_prefetch=0,
            grid=grid,
            in_specs=in_specs,
            out_specs=out_specs,
        ),
        compiler_params=pltpu.CompilerParams(
            dimension_semantics=("parallel",),   # batch steps are independent
            vmem_limit_bytes=_vmem_limit_bytes(),
        ),
    )(x, ctx_bf16, *kparams)

    # Match PyTorch return: (None, dist_sap_head(attn_out).squeeze(2), fuse_w)
    return None, dist, fuse


if __name__ == "__main__":
    key = jax.random.PRNGKey(0)
    kx, kc, kp = jax.random.split(key, 3)

    B, Lq, Lk = 2, 8, 8
    x = jax.random.normal(kx, (B, Lq, HIDDEN), jnp.float32)
    ins_img = jax.random.normal(kc, (B, Lk, CTX_DIM), jnp.float32)
    params = init_params(kp)

    _, dist, fuse_weight = node_dist_reg(x, ins_img, params)
    jax.block_until_ready((dist, fuse_weight))

    assert dist.shape == (B, Lq)
    assert fuse_weight.shape == (B, 1)
    assert bool(jnp.all(jnp.isfinite(dist)))
    assert bool(jnp.all((fuse_weight > 0.0) & (fuse_weight < 1.0)))
    print("KERNEL_OK")
</pallas_src>

<mosaic_0001>
module attributes {stable_mosaic.version = 11 : i64} {
  func.func @_node_dist_reg_kernel(%arg0: i32, %arg1: memref<2x8x64xf32, #tpu.memory_space<vmem>>, %arg2: memref<2x8x768xbf16, #tpu.memory_space<vmem>>, %arg3: memref<64x64xf32, #tpu.memory_space<vmem>>, %arg4: memref<1x64xf32, #tpu.memory_space<vmem>>, %arg5: memref<768x128xbf16, #tpu.memory_space<vmem>>, %arg6: memref<1x128xf32, #tpu.memory_space<vmem>>, %arg7: memref<64x64xf32, #tpu.memory_space<vmem>>, %arg8: memref<1x64xf32, #tpu.memory_space<vmem>>, %arg9: memref<1x64xf32, #tpu.memory_space<vmem>>, %arg10: memref<1x64xf32, #tpu.memory_space<vmem>>, %arg11: memref<128x64xf32, #tpu.memory_space<vmem>>, %arg12: memref<1x64xf32, #tpu.memory_space<vmem>>, %arg13: memref<1x64xf32, #tpu.memory_space<vmem>>, %arg14: memref<1x64xf32, #tpu.memory_space<vmem>>, %arg15: memref<1x64xf32, #tpu.memory_space<vmem>>, %arg16: memref<1x1xf32, #tpu.memory_space<vmem>>, %arg17: memref<64x64xf32, #tpu.memory_space<vmem>>, %arg18: memref<1x64xf32, #tpu.memory_space<vmem>>, %arg19: memref<1x64xf32, #tpu.memory_space<vmem>>, %arg20: memref<1x64xf32, #tpu.memory_space<vmem>>, %arg21: memref<1x64xf32, #tpu.memory_space<vmem>>, %arg22: memref<1x1xf32, #tpu.memory_space<vmem>>, %arg23: memref<2x8xf32, #tpu.memory_space<vmem>>, %arg24: memref<2x1xf32, #tpu.memory_space<vmem>>) attributes {dimension_semantics = [#tpu.dimension_semantics<parallel>], iteration_bounds = array<i64: 1>, scalar_prefetch = 0 : i64, scratch_operands = 0 : i64, tpu.core_type = #tpu.core_type<tc>, window_params = [{transform_indices = @transform_0, window_bounds = array<i64: 2, 8, 64>}, {transform_indices = @transform_1, window_bounds = array<i64: 2, 8, 768>}, {pipeline_mode = #tpu.pipeline_mode<synchronous>, transform_indices = @transform_2, window_bounds = array<i64: 64, 64>}, {pipeline_mode = #tpu.pipeline_mode<synchronous>, transform_indices = @transform_3, window_bounds = array<i64: 1, 64>}, {pipeline_mode = #tpu.pipeline_mode<synchronous>, transform_indices = @transform_4, window_bounds = array<i64: 768, 128>}, {pipeline_mode = #tpu.pipeline_mode<synchronous>, transform_indices = @transform_5, window_bounds = array<i64: 1, 128>}, {pipeline_mode = #tpu.pipeline_mode<synchronous>, transform_indices = @transform_6, window_bounds = array<i64: 64, 64>}, {pipeline_mode = #tpu.pipeline_mode<synchronous>, transform_indices = @transform_7, window_bounds = array<i64: 1, 64>}, {pipeline_mode = #tpu.pipeline_mode<synchronous>, transform_indices = @transform_8, window_bounds = array<i64: 1, 64>}, {pipeline_mode = #tpu.pipeline_mode<synchronous>, transform_indices = @transform_9, window_bounds = array<i64: 1, 64>}, {pipeline_mode = #tpu.pipeline_mode<synchronous>, transform_indices = @transform_10, window_bounds = array<i64: 128, 64>}, {pipeline_mode = #tpu.pipeline_mode<synchronous>, transform_indices = @transform_11, window_bounds = array<i64: 1, 64>}, {pipeline_mode = #tpu.pipeline_mode<synchronous>, transform_indices = @transform_12, window_bounds = array<i64: 1, 64>}, {pipeline_mode = #tpu.pipeline_mode<synchronous>, transform_indices = @transform_13, window_bounds = array<i64: 1, 64>}, {pipeline_mode = #tpu.pipeline_mode<synchronous>, transform_indices = @transform_14, window_bounds = array<i64: 1, 64>}, {pipeline_mode = #tpu.pipeline_mode<synchronous>, transform_indices = @transform_15, window_bounds = array<i64: 1, 1>}, {pipeline_mode = #tpu.pipeline_mode<synchronous>, transform_indices = @transform_16, window_bounds = array<i64: 64, 64>}, {pipeline_mode = #tpu.pipeline_mode<synchronous>, transform_indices = @transform_17, window_bounds = array<i64: 1, 64>}, {pipeline_mode = #tpu.pipeline_mode<synchronous>, transform_indices = @transform_18, window_bounds = array<i64: 1, 64>}, {pipeline_mode = #tpu.pipeline_mode<synchronous>, transform_indices = @transform_19, window_bounds = array<i64: 1, 64>}, {pipeline_mode = #tpu.pipeline_mode<synchronous>, transform_indices = @transform_20, window_bounds = array<i64: 1, 64>}, {pipeline_mode = #tpu.pipeline_mode<synchronous>, transform_indices = @transform_21, window_bounds = array<i64: 1, 1>}, {transform_indices = @transform_22, window_bounds = array<i64: 2, 8>}, {transform_indices = @transform_23, window_bounds = array<i64: 2, 1>}]} {
    %c0 = arith.constant 0 : index
    %c0_0 = arith.constant 0 : index
    %c0_1 = arith.constant 0 : index
    %0 = vector.load %arg1[%c0, %c0_0, %c0_1] : memref<2x8x64xf32, #tpu.memory_space<vmem>>, vector<2x8x64xf32>
    %1 = vector.shape_cast %0 : vector<2x8x64xf32> to vector<16x64xf32>
    %c0_2 = arith.constant 0 : index
    %c0_3 = arith.constant 0 : index
    %c0_4 = arith.constant 0 : index
    %2 = vector.load %arg2[%c0_2, %c0_3, %c0_4] : memref<2x8x768xbf16, #tpu.memory_space<vmem>>, vector<2x8x768xbf16>
    %3 = vector.shape_cast %2 : vector<2x8x768xbf16> to vector<16x768xbf16>
    %c0_5 = arith.constant 0 : index
    %c0_6 = arith.constant 0 : index
    %4 = vector.load %arg3[%c0_5, %c0_6] : memref<64x64xf32, #tpu.memory_space<vmem>>, vector<64x64xf32>
    %cst = arith.constant dense<0.000000e+00> : vector<16x64xf32>
    %5 = tpu.matmul %1, %4, %cst {dimension_numbers = #tpu.dot_dimension_numbers<[1], [0], [0], [1], [0, 0, 1, 1], [], []>} : vector<16x64xf32>, vector<64x64xf32>, vector<16x64xf32> -> vector<16x64xf32>
    %c0_7 = arith.constant 0 : index
    %c0_8 = arith.constant 0 : index
    %6 = vector.load %arg4[%c0_7, %c0_8] : memref<1x64xf32, #tpu.memory_space<vmem>>, vector<1x64xf32>
    %7 = vector.broadcast %6 : vector<1x64xf32> to vector<16x64xf32>
    %8 = arith.addf %5, %7 : vector<16x64xf32>
    %cst_9 = arith.constant 2.500000e-01 : f32
    %9 = vector.broadcast %cst_9 : f32 to vector<16x64xf32>
    %10 = arith.mulf %8, %9 : vector<16x64xf32>
    %c0_10 = arith.constant 0 : index
    %c0_11 = arith.constant 0 : index
    %11 = vector.load %arg5[%c0_10, %c0_11] : memref<768x128xbf16, #tpu.memory_space<vmem>>, vector<768x128xbf16>
    %cst_12 = arith.constant dense<0.000000e+00> : vector<16x128xf32>
    %12 = tpu.matmul %3, %11, %cst_12 {dimension_numbers = #tpu.dot_dimension_numbers<[1], [0], [0], [1], [0, 0, 1, 1], [], []>} : vector<16x768xbf16>, vector<768x128xbf16>, vector<16x128xf32> -> vector<16x128xf32>
    %c0_13 = arith.constant 0 : index
    %c0_14 = arith.constant 0 : index
    %13 = vector.load %arg6[%c0_13, %c0_14] : memref<1x128xf32, #tpu.memory_space<vmem>>, vector<1x128xf32>
    %14 = vector.broadcast %13 : vector<1x128xf32> to vector<16x128xf32>
    %15 = arith.addf %12, %14 : vector<16x128xf32>
    %16 = vector.shape_cast %10 : vector<16x64xf32> to vector<2x8x64xf32>
    %17 = vector.extract_strided_slice %15 {offsets = [0, 0], sizes = [16, 64], strides = [1, 1]} : vector<16x128xf32> to vector<16x64xf32>
    %18 = vector.shape_cast %17 : vector<16x64xf32> to vector<2x8x64xf32>
    %19 = vector.extract_strided_slice %15 {offsets = [0, 64], sizes = [16, 64], strides = [1, 1]} : vector<16x128xf32> to vector<16x64xf32>
    %20 = vector.shape_cast %19 : vector<16x64xf32> to vector<2x8x64xf32>
    %21 = vector.extract_strided_slice %16 {offsets = [0, 0, 0], sizes = [2, 8, 16], strides = [1, 1, 1]} : vector<2x8x64xf32> to vector<2x8x16xf32>
    %22 = vector.extract_strided_slice %18 {offsets = [0, 0, 0], sizes = [2, 8, 16], strides = [1, 1, 1]} : vector<2x8x64xf32> to vector<2x8x16xf32>
    %23 = vector.extract_strided_slice %20 {offsets = [0, 0, 0], sizes = [2, 8, 16], strides = [1, 1, 1]} : vector<2x8x64xf32> to vector<2x8x16xf32>
    %cst_15 = arith.constant dense<0.000000e+00> : vector<2x8x8xf32>
    %24 = tpu.matmul %21, %22, %cst_15 {dimension_numbers = #tpu.dot_dimension_numbers<[2], [2], [1], [1], [0, 0, 0, 1, 1, 1], [0], [0]>} : vector<2x8x16xf32>, vector<2x8x16xf32>, vector<2x8x8xf32> -> vector<2x8x8xf32>
    %cst_16 = arith.constant dense<0xFF800000> : vector<2x8xf32>
    %25 = vector.multi_reduction <maximumf>, %24, %cst_16 [2] : vector<2x8x8xf32> to vector<2x8xf32>
    %26 = vector.shape_cast %25 : vector<2x8xf32> to vector<2x8x1xf32>
    %27 = vector.broadcast %26 : vector<2x8x1xf32> to vector<2x8x8xf32>
    %28 = arith.subf %24, %27 : vector<2x8x8xf32>
    %29 = math.exp %28 : vector<2x8x8xf32>
    %cst_17 = arith.constant dense<0.000000e+00> : vector<2x8xf32>
    %30 = vector.multi_reduction <add>, %29, %cst_17 [2] : vector<2x8x8xf32> to vector<2x8xf32>
    %31 = vector.shape_cast %30 : vector<2x8xf32> to vector<2x8x1xf32>
    %32 = tpu.reciprocal %31 {approx = true} : vector<2x8x1xf32> -> vector<2x8x1xf32>
    %33 = vector.broadcast %32 : vector<2x8x1xf32> to vector<2x8x8xf32>
    %34 = arith.mulf %29, %33 : vector<2x8x8xf32>
    %cst_18 = arith.constant dense<0.000000e+00> : vector<2x8x16xf32>
    %35 = tpu.matmul %34, %23, %cst_18 {dimension_numbers = #tpu.dot_dimension_numbers<[2], [1], [1], [2], [0, 0, 0, 1, 1, 2], [0], [0]>} : vector<2x8x8xf32>, vector<2x8x16xf32>, vector<2x8x16xf32> -> vector<2x8x16xf32>
    %36 = vector.shape_cast %35 : vector<2x8x16xf32> to vector<16x16xf32>
    %c0_19 = arith.constant 0 : index
    %c0_20 = arith.constant 0 : index
    %37 = vector.load %arg7[%c0_19, %c0_20] : memref<64x64xf32, #tpu.memory_space<vmem>>, vector<16x64xf32>
    %cst_21 = arith.constant dense<0.000000e+00> : vector<16x64xf32>
    %38 = tpu.matmul %36, %37, %cst_21 {dimension_numbers = #tpu.dot_dimension_numbers<[1], [0], [0], [1], [0, 0, 1, 1], [], []>} : vector<16x16xf32>, vector<16x64xf32>, vector<16x64xf32> -> vector<16x64xf32>
    %39 = vector.extract_strided_slice %16 {offsets = [0, 0, 16], sizes = [2, 8, 16], strides = [1, 1, 1]} : vector<2x8x64xf32> to vector<2x8x16xf32>
    %40 = vector.extract_strided_slice %18 {offsets = [0, 0, 16], sizes = [2, 8, 16], strides = [1, 1, 1]} : vector<2x8x64xf32> to vector<2x8x16xf32>
    %41 = vector.extract_strided_slice %20 {offsets = [0, 0, 16], sizes = [2, 8, 16], strides = [1, 1, 1]} : vector<2x8x64xf32> to vector<2x8x16xf32>
    %cst_22 = arith.constant dense<0.000000e+00> : vector<2x8x8xf32>
    %42 = tpu.matmul %39, %40, %cst_22 {dimension_numbers = #tpu.dot_dimension_numbers<[2], [2], [1], [1], [0, 0, 0, 1, 1, 1], [0], [0]>} : vector<2x8x16xf32>, vector<2x8x16xf32>, vector<2x8x8xf32> -> vector<2x8x8xf32>
    %cst_23 = arith.constant dense<0xFF800000> : vector<2x8xf32>
    %43 = vector.multi_reduction <maximumf>, %42, %cst_23 [2] : vector<2x8x8xf32> to vector<2x8xf32>
    %44 = vector.shape_cast %43 : vector<2x8xf32> to vector<2x8x1xf32>
    %45 = vector.broadcast %44 : vector<2x8x1xf32> to vector<2x8x8xf32>
    %46 = arith.subf %42, %45 : vector<2x8x8xf32>
    %47 = math.exp %46 : vector<2x8x8xf32>
    %cst_24 = arith.constant dense<0.000000e+00> : vector<2x8xf32>
    %48 = vector.multi_reduction <add>, %47, %cst_24 [2] : vector<2x8x8xf32> to vector<2x8xf32>
    %49 = vector.shape_cast %48 : vector<2x8xf32> to vector<2x8x1xf32>
    %50 = tpu.reciprocal %49 {approx = true} : vector<2x8x1xf32> -> vector<2x8x1xf32>
    %51 = vector.broadcast %50 : vector<2x8x1xf32> to vector<2x8x8xf32>
    %52 = arith.mulf %47, %51 : vector<2x8x8xf32>
    %cst_25 = arith.constant dense<0.000000e+00> : vector<2x8x16xf32>
    %53 = tpu.matmul %52, %41, %cst_25 {dimension_numbers = #tpu.dot_dimension_numbers<[2], [1], [1], [2], [0, 0, 0, 1, 1, 2], [0], [0]>} : vector<2x8x8xf32>, vector<2x8x16xf32>, vector<2x8x16xf32> -> vector<2x8x16xf32>
    %54 = vector.shape_cast %53 : vector<2x8x16xf32> to vector<16x16xf32>
    %c16 = arith.constant 16 : index
    %c0_26 = arith.constant 0 : index
    %55 = vector.load %arg7[%c16, %c0_26] : memref<64x64xf32, #tpu.memory_space<vmem>>, vector<16x64xf32>
    %cst_27 = arith.constant dense<0.000000e+00> : vector<16x64xf32>
    %56 = tpu.matmul %54, %55, %cst_27 {dimension_numbers = #tpu.dot_dimension_numbers<[1], [0], [0], [1], [0, 0, 1, 1], [], []>} : vector<16x16xf32>, vector<16x64xf32>, vector<16x64xf32> -> vector<16x64xf32>
    %57 = arith.addf %38, %56 : vector<16x64xf32>
    %58 = vector.extract_strided_slice %16 {offsets = [0, 0, 32], sizes = [2, 8, 16], strides = [1, 1, 1]} : vector<2x8x64xf32> to vector<2x8x16xf32>
    %59 = vector.extract_strided_slice %18 {offsets = [0, 0, 32], sizes = [2, 8, 16], strides = [1, 1, 1]} : vector<2x8x64xf32> to vector<2x8x16xf32>
    %60 = vector.extract_strided_slice %20 {offsets = [0, 0, 32], sizes = [2, 8, 16], strides = [1, 1, 1]} : vector<2x8x64xf32> to vector<2x8x16xf32>
    %cst_28 = arith.constant dense<0.000000e+00> : vector<2x8x8xf32>
    %61 = tpu.matmul %58, %59, %cst_28 {dimension_numbers = #tpu.dot_dimension_numbers<[2], [2], [1], [1], [0, 0, 0, 1, 1, 1], [0], [0]>} : vector<2x8x16xf32>, vector<2x8x16xf32>, vector<2x8x8xf32> -> vector<2x8x8xf32>
    %cst_29 = arith.constant dense<0xFF800000> : vector<2x8xf32>
    %62 = vector.multi_reduction <maximumf>, %61, %cst_29 [2] : vector<2x8x8xf32> to vector<2x8xf32>
    %63 = vector.shape_cast %62 : vector<2x8xf32> to vector<2x8x1xf32>
    %64 = vector.broadcast %63 : vector<2x8x1xf32> to vector<2x8x8xf32>
    %65 = arith.subf %61, %64 : vector<2x8x8xf32>
    %66 = math.exp %65 : vector<2x8x8xf32>
    %cst_30 = arith.constant dense<0.000000e+00> : vector<2x8xf32>
    %67 = vector.multi_reduction <add>, %66, %cst_30 [2] : vector<2x8x8xf32> to vector<2x8xf32>
    %68 = vector.shape_cast %67 : vector<2x8xf32> to vector<2x8x1xf32>
    %69 = tpu.reciprocal %68 {approx = true} : vector<2x8x1xf32> -> vector<2x8x1xf32>
    %70 = vector.broadcast %69 : vector<2x8x1xf32> to vector<2x8x8xf32>
    %71 = arith.mulf %66, %70 : vector<2x8x8xf32>
    %cst_31 = arith.constant dense<0.000000e+00> : vector<2x8x16xf32>
    %72 = tpu.matmul %71, %60, %cst_31 {dimension_numbers = #tpu.dot_dimension_numbers<[2], [1], [1], [2], [0, 0, 0, 1, 1, 2], [0], [0]>} : vector<2x8x8xf32>, vector<2x8x16xf32>, vector<2x8x16xf32> -> vector<2x8x16xf32>
    %73 = vector.shape_cast %72 : vector<2x8x16xf32> to vector<16x16xf32>
    %c32 = arith.constant 32 : index
    %c0_32 = arith.constant 0 : index
    %74 = vector.load %arg7[%c32, %c0_32] : memref<64x64xf32, #tpu.memory_space<vmem>>, vector<16x64xf32>
    %cst_33 = arith.constant dense<0.000000e+00> : vector<16x64xf32>
    %75 = tpu.matmul %73, %74, %cst_33 {dimension_numbers = #tpu.dot_dimension_numbers<[1], [0], [0], [1], [0, 0, 1, 1], [], []>} : vector<16x16xf32>, vector<16x64xf32>, vector<16x64xf32> -> vector<16x64xf32>
    %76 = arith.addf %57, %75 : vector<16x64xf32>
    %77 = vector.extract_strided_slice %16 {offsets = [0, 0, 48], sizes = [2, 8, 16], strides = [1, 1, 1]} : vector<2x8x64xf32> to vector<2x8x16xf32>
    %78 = vector.extract_strided_slice %18 {offsets = [0, 0, 48], sizes = [2, 8, 16], strides = [1, 1, 1]} : vector<2x8x64xf32> to vector<2x8x16xf32>
    %79 = vector.extract_strided_slice %20 {offsets = [0, 0, 48], sizes = [2, 8, 16], strides = [1, 1, 1]} : vector<2x8x64xf32> to vector<2x8x16xf32>
    %cst_34 = arith.constant dense<0.000000e+00> : vector<2x8x8xf32>
    %80 = tpu.matmul %77, %78, %cst_34 {dimension_numbers = #tpu.dot_dimension_numbers<[2], [2], [1], [1], [0, 0, 0, 1, 1, 1], [0], [0]>} : vector<2x8x16xf32>, vector<2x8x16xf32>, vector<2x8x8xf32> -> vector<2x8x8xf32>
    %cst_35 = arith.constant dense<0xFF800000> : vector<2x8xf32>
    %81 = vector.multi_reduction <maximumf>, %80, %cst_35 [2] : vector<2x8x8xf32> to vector<2x8xf32>
    %82 = vector.shape_cast %81 : vector<2x8xf32> to vector<2x8x1xf32>
    %83 = vector.broadcast %82 : vector<2x8x1xf32> to vector<2x8x8xf32>
    %84 = arith.subf %80, %83 : vector<2x8x8xf32>
    %85 = math.exp %84 : vector<2x8x8xf32>
    %cst_36 = arith.constant dense<0.000000e+00> : vector<2x8xf32>
    %86 = vector.multi_reduction <add>, %85, %cst_36 [2] : vector<2x8x8xf32> to vector<2x8xf32>
    %87 = vector.shape_cast %86 : vector<2x8xf32> to vector<2x8x1xf32>
    %88 = tpu.reciprocal %87 {approx = true} : vector<2x8x1xf32> -> vector<2x8x1xf32>
    %89 = vector.broadcast %88 : vector<2x8x1xf32> to vector<2x8x8xf32>
    %90 = arith.mulf %85, %89 : vector<2x8x8xf32>
    %cst_37 = arith.constant dense<0.000000e+00> : vector<2x8x16xf32>
    %91 = tpu.matmul %90, %79, %cst_37 {dimension_numbers = #tpu.dot_dimension_numbers<[2], [1], [1], [2], [0, 0, 0, 1, 1, 2], [0], [0]>} : vector<2x8x8xf32>, vector<2x8x16xf32>, vector<2x8x16xf32> -> vector<2x8x16xf32>
    %92 = vector.shape_cast %91 : vector<2x8x16xf32> to vector<16x16xf32>
    %c48 = arith.constant 48 : index
    %c0_38 = arith.constant 0 : index
    %93 = vector.load %arg7[%c48, %c0_38] : memref<64x64xf32, #tpu.memory_space<vmem>>, vector<16x64xf32>
    %cst_39 = arith.constant dense<0.000000e+00> : vector<16x64xf32>
    %94 = tpu.matmul %92, %93, %cst_39 {dimension_numbers = #tpu.dot_dimension_numbers<[1], [0], [0], [1], [0, 0, 1, 1], [], []>} : vector<16x16xf32>, vector<16x64xf32>, vector<16x64xf32> -> vector<16x64xf32>
    %95 = arith.addf %76, %94 : vector<16x64xf32>
    %c0_40 = arith.constant 0 : index
    %c0_41 = arith.constant 0 : index
    %96 = vector.load %arg8[%c0_40, %c0_41] : memref<1x64xf32, #tpu.memory_space<vmem>>, vector<1x64xf32>
    %97 = vector.broadcast %96 : vector<1x64xf32> to vector<16x64xf32>
    %98 = arith.addf %95, %97 : vector<16x64xf32>
    %99 = arith.addf %98, %1 : vector<16x64xf32>
    %c0_42 = arith.constant 0 : index
    %c0_43 = arith.constant 0 : index
    %100 = vector.load %arg9[%c0_42, %c0_43] : memref<1x64xf32, #tpu.memory_space<vmem>>, vector<1x64xf32>
    %c0_44 = arith.constant 0 : index
    %c0_45 = arith.constant 0 : index
    %101 = vector.load %arg10[%c0_44, %c0_45] : memref<1x64xf32, #tpu.memory_space<vmem>>, vector<1x64xf32>
    %cst_46 = arith.constant dense<0.000000e+00> : vector<16xf32>
    %102 = vector.multi_reduction <add>, %99, %cst_46 [1] : vector<16x64xf32> to vector<16xf32>
    %103 = vector.shape_cast %102 : vector<16xf32> to vector<16x1xf32>
    %cst_47 = arith.constant 6.400000e+01 : f32
    %104 = vector.broadcast %cst_47 : f32 to vector<16x1xf32>
    %105 = arith.divf %103, %104 : vector<16x1xf32>
    %106 = vector.broadcast %105 : vector<16x1xf32> to vector<16x64xf32>
    %107 = arith.subf %99, %106 : vector<16x64xf32>
    %108 = arith.mulf %107, %107 : vector<16x64xf32>
    %cst_48 = arith.constant dense<0.000000e+00> : vector<16xf32>
    %109 = vector.multi_reduction <add>, %108, %cst_48 [1] : vector<16x64xf32> to vector<16xf32>
    %110 = vector.shape_cast %109 : vector<16xf32> to vector<16x1xf32>
    %cst_49 = arith.constant 6.400000e+01 : f32
    %111 = vector.broadcast %cst_49 : f32 to vector<16x1xf32>
    %112 = arith.divf %110, %111 : vector<16x1xf32>
    %113 = vector.broadcast %105 : vector<16x1xf32> to vector<16x64xf32>
    %114 = arith.subf %99, %113 : vector<16x64xf32>
    %115 = vector.broadcast %100 : vector<1x64xf32> to vector<16x64xf32>
    %116 = arith.mulf %115, %114 : vector<16x64xf32>
    %cst_50 = arith.constant 9.99999996E-13 : f32
    %117 = vector.broadcast %cst_50 : f32 to vector<16x1xf32>
    %118 = arith.addf %112, %117 : vector<16x1xf32>
    %119 = math.rsqrt %118 : vector<16x1xf32>
    %120 = vector.broadcast %119 : vector<16x1xf32> to vector<16x64xf32>
    %121 = arith.mulf %116, %120 : vector<16x64xf32>
    %122 = vector.broadcast %101 : vector<1x64xf32> to vector<16x64xf32>
    %123 = arith.addf %121, %122 : vector<16x64xf32>
    %c0_51 = arith.constant 0 : index
    %c0_52 = arith.constant 0 : index
    %124 = vector.load %arg17[%c0_51, %c0_52] : memref<64x64xf32, #tpu.memory_space<vmem>>, vector<64x64xf32>
    %cst_53 = arith.constant dense<0.000000e+00> : vector<16x64xf32>
    %125 = tpu.matmul %123, %124, %cst_53 {dimension_numbers = #tpu.dot_dimension_numbers<[1], [0], [0], [1], [0, 0, 1, 1], [], []>} : vector<16x64xf32>, vector<64x64xf32>, vector<16x64xf32> -> vector<16x64xf32>
    %c0_54 = arith.constant 0 : index
    %c0_55 = arith.constant 0 : index
    %126 = vector.load %arg18[%c0_54, %c0_55] : memref<1x64xf32, #tpu.memory_space<vmem>>, vector<1x64xf32>
    %127 = vector.broadcast %126 : vector<1x64xf32> to vector<16x64xf32>
    %128 = arith.addf %125, %127 : vector<16x64xf32>
    %cst_56 = arith.constant 0.000000e+00 : f32
    %129 = vector.broadcast %cst_56 : f32 to vector<16x64xf32>
    %130 = arith.maximumf %128, %129 : vector<16x64xf32>
    %c0_57 = arith.constant 0 : index
    %c0_58 = arith.constant 0 : index
    %131 = vector.load %arg19[%c0_57, %c0_58] : memref<1x64xf32, #tpu.memory_space<vmem>>, vector<1x64xf32>
    %c0_59 = arith.constant 0 : index
    %c0_60 = arith.constant 0 : index
    %132 = vector.load %arg20[%c0_59, %c0_60] : memref<1x64xf32, #tpu.memory_space<vmem>>, vector<1x64xf32>
    %cst_61 = arith.constant dense<0.000000e+00> : vector<16xf32>
    %133 = vector.multi_reduction <add>, %130, %cst_61 [1] : vector<16x64xf32> to vector<16xf32>
    %134 = vector.shape_cast %133 : vector<16xf32> to vector<16x1xf32>
    %cst_62 = arith.constant 6.400000e+01 : f32
    %135 = vector.broadcast %cst_62 : f32 to vector<16x1xf32>
    %136 = arith.divf %134, %135 : vector<16x1xf32>
    %137 = vector.broadcast %136 : vector<16x1xf32> to vector<16x64xf32>
    %138 = arith.subf %130, %137 : vector<16x64xf32>
    %139 = arith.mulf %138, %138 : vector<16x64xf32>
    %cst_63 = arith.constant dense<0.000000e+00> : vector<16xf32>
    %140 = vector.multi_reduction <add>, %139, %cst_63 [1] : vector<16x64xf32> to vector<16xf32>
    %141 = vector.shape_cast %140 : vector<16xf32> to vector<16x1xf32>
    %cst_64 = arith.constant 6.400000e+01 : f32
    %142 = vector.broadcast %cst_64 : f32 to vector<16x1xf32>
    %143 = arith.divf %141, %142 : vector<16x1xf32>
    %144 = vector.broadcast %136 : vector<16x1xf32> to vector<16x64xf32>
    %145 = arith.subf %130, %144 : vector<16x64xf32>
    %146 = vector.broadcast %131 : vector<1x64xf32> to vector<16x64xf32>
    %147 = arith.mulf %146, %145 : vector<16x64xf32>
    %cst_65 = arith.constant 9.99999996E-13 : f32
    %148 = vector.broadcast %cst_65 : f32 to vector<16x1xf32>
    %149 = arith.addf %143, %148 : vector<16x1xf32>
    %150 = math.rsqrt %149 : vector<16x1xf32>
    %151 = vector.broadcast %150 : vector<16x1xf32> to vector<16x64xf32>
    %152 = arith.mulf %147, %151 : vector<16x64xf32>
    %153 = vector.broadcast %132 : vector<1x64xf32> to vector<16x64xf32>
    %154 = arith.addf %152, %153 : vector<16x64xf32>
    %155 = vector.shape_cast %154 : vector<16x64xf32> to vector<2x8x64xf32>
    %c0_66 = arith.constant 0 : index
    %c0_67 = arith.constant 0 : index
    %156 = vector.load %arg21[%c0_66, %c0_67] : memref<1x64xf32, #tpu.memory_space<vmem>>, vector<1x64xf32>
    %157 = vector.shape_cast %156 : vector<1x64xf32> to vector<1x1x64xf32>
    %158 = vector.broadcast %157 : vector<1x1x64xf32> to vector<2x8x64xf32>
    %159 = arith.mulf %155, %158 : vector<2x8x64xf32>
    %cst_68 = arith.constant dense<0.000000e+00> : vector<2x8xf32>
    %160 = vector.multi_reduction <add>, %159, %cst_68 [2] : vector<2x8x64xf32> to vector<2x8xf32>
    %c0_69 = arith.constant 0 : index
    %c0_70 = arith.constant 0 : index
    %161 = vector.load %arg22[%c0_69, %c0_70] : memref<1x1xf32, #tpu.memory_space<vmem>>, vector<1x1xf32>
    %162 = vector.broadcast %161 : vector<1x1xf32> to vector<2x8xf32>
    %163 = arith.addf %160, %162 : vector<2x8xf32>
    %c0_71 = arith.constant 0 : index
    %c0_72 = arith.constant 0 : index
    %164 = vector.load %arg23[%c0_71, %c0_72] : memref<2x8xf32, #tpu.memory_space<vmem>>, vector<2x8xf32>
    tpu.vector_store %arg23[%c0_71, %c0_72], %163 {strides = array<i32>} : memref<2x8xf32, #tpu.memory_space<vmem>>, vector<2x8xf32>,
    %165 = vector.shape_cast %123 : vector<16x64xf32> to vector<2x8x64xf32>
    %166 = vector.extract_strided_slice %0 {offsets = [0, 0, 0], sizes = [2, 1, 64], strides = [1, 1, 1]} : vector<2x8x64xf32> to vector<2x1x64xf32>
    %167 = vector.shape_cast %166 : vector<2x1x64xf32> to vector<2x64xf32>
    %168 = vector.extract_strided_slice %165 {offsets = [0, 0, 0], sizes = [2, 1, 64], strides = [1, 1, 1]} : vector<2x8x64xf32> to vector<2x1x64xf32>
    %169 = vector.shape_cast %168 : vector<2x1x64xf32> to vector<2x64xf32>
    %c0_73 = arith.constant 0 : index
    %c0_74 = arith.constant 0 : index
    %170 = vector.load %arg11[%c0_73, %c0_74] : memref<128x64xf32, #tpu.memory_space<vmem>>, vector<64x64xf32>
    %cst_75 = arith.constant dense<0.000000e+00> : vector<2x64xf32>
    %171 = tpu.matmul %167, %170, %cst_75 {dimension_numbers = #tpu.dot_dimension_numbers<[1], [0], [0], [1], [0, 0, 1, 1], [], []>} : vector<2x64xf32>, vector<64x64xf32>, vector<2x64xf32> -> vector<2x64xf32>
    %c64 = arith.constant 64 : index
    %c0_76 = arith.constant 0 : index
    %172 = vector.load %arg11[%c64, %c0_76] : memref<128x64xf32, #tpu.memory_space<vmem>>, vector<64x64xf32>
    %cst_77 = arith.constant dense<0.000000e+00> : vector<2x64xf32>
    %173 = tpu.matmul %169, %172, %cst_77 {dimension_numbers = #tpu.dot_dimension_numbers<[1], [0], [0], [1], [0, 0, 1, 1], [], []>} : vector<2x64xf32>, vector<64x64xf32>, vector<2x64xf32> -> vector<2x64xf32>
    %174 = arith.addf %171, %173 : vector<2x64xf32>
    %c0_78 = arith.constant 0 : index
    %c0_79 = arith.constant 0 : index
    %175 = vector.load %arg12[%c0_78, %c0_79] : memref<1x64xf32, #tpu.memory_space<vmem>>, vector<1x64xf32>
    %176 = vector.broadcast %175 : vector<1x64xf32> to vector<2x64xf32>
    %177 = arith.addf %174, %176 : vector<2x64xf32>
    %cst_80 = arith.constant 0.000000e+00 : f32
    %178 = vector.broadcast %cst_80 : f32 to vector<2x64xf32>
    %179 = arith.maximumf %177, %178 : vector<2x64xf32>
    %c0_81 = arith.constant 0 : index
    %c0_82 = arith.constant 0 : index
    %180 = vector.load %arg13[%c0_81, %c0_82] : memref<1x64xf32, #tpu.memory_space<vmem>>, vector<1x64xf32>
    %c0_83 = arith.constant 0 : index
    %c0_84 = arith.constant 0 : index
    %181 = vector.load %arg14[%c0_83, %c0_84] : memref<1x64xf32, #tpu.memory_space<vmem>>, vector<1x64xf32>
    %cst_85 = arith.constant dense<0.000000e+00> : vector<2xf32>
    %182 = vector.multi_reduction <add>, %179, %cst_85 [1] : vector<2x64xf32> to vector<2xf32>
    %183 = vector.shape_cast %182 : vector<2xf32> to vector<2x1xf32>
    %cst_86 = arith.constant 6.400000e+01 : f32
    %184 = vector.broadcast %cst_86 : f32 to vector<2x1xf32>
    %185 = arith.divf %183, %184 : vector<2x1xf32>
    %186 = vector.broadcast %185 : vector<2x1xf32> to vector<2x64xf32>
    %187 = arith.subf %179, %186 : vector<2x64xf32>
    %188 = arith.mulf %187, %187 : vector<2x64xf32>
    %cst_87 = arith.constant dense<0.000000e+00> : vector<2xf32>
    %189 = vector.multi_reduction <add>, %188, %cst_87 [1] : vector<2x64xf32> to vector<2xf32>
    %190 = vector.shape_cast %189 : vector<2xf32> to vector<2x1xf32>
    %cst_88 = arith.constant 6.400000e+01 : f32
    %191 = vector.broadcast %cst_88 : f32 to vector<2x1xf32>
    %192 = arith.divf %190, %191 : vector<2x1xf32>
    %193 = vector.broadcast %185 : vector<2x1xf32> to vector<2x64xf32>
    %194 = arith.subf %179, %193 : vector<2x64xf32>
    %195 = vector.broadcast %180 : vector<1x64xf32> to vector<2x64xf32>
    %196 = arith.mulf %195, %194 : vector<2x64xf32>
    %cst_89 = arith.constant 9.99999996E-13 : f32
    %197 = vector.broadcast %cst_89 : f32 to vector<2x1xf32>
    %198 = arith.addf %192, %197 : vector<2x1xf32>
    %199 = math.rsqrt %198 : vector<2x1xf32>
    %200 = vector.broadcast %199 : vector<2x1xf32> to vector<2x64xf32>
    %201 = arith.mulf %196, %200 : vector<2x64xf32>
    %202 = vector.broadcast %181 : vector<1x64xf32> to vector<2x64xf32>
    %203 = arith.addf %201, %202 : vector<2x64xf32>
    %c0_90 = arith.constant 0 : index
    %c0_91 = arith.constant 0 : index
    %204 = vector.load %arg15[%c0_90, %c0_91] : memref<1x64xf32, #tpu.memory_space<vmem>>, vector<1x64xf32>
    %205 = vector.broadcast %204 : vector<1x64xf32> to vector<2x64xf32>
    %206 = arith.mulf %203, %205 : vector<2x64xf32>
    %cst_92 = arith.constant dense<0.000000e+00> : vector<2xf32>
    %207 = vector.multi_reduction <add>, %206, %cst_92 [1] : vector<2x64xf32> to vector<2xf32>
    %208 = vector.shape_cast %207 : vector<2xf32> to vector<2x1xf32>
    %c0_93 = arith.constant 0 : index
    %c0_94 = arith.constant 0 : index
    %209 = vector.load %arg16[%c0_93, %c0_94] : memref<1x1xf32, #tpu.memory_space<vmem>>, vector<1x1xf32>
    %210 = vector.broadcast %209 : vector<1x1xf32> to vector<2x1xf32>
    %211 = arith.addf %208, %210 : vector<2x1xf32>
    %212 = arith.negf %211 : vector<2x1xf32>
    %213 = math.exp %212 : vector<2x1xf32>
    %cst_95 = arith.constant 1.000000e+00 : f32
    %214 = vector.broadcast %cst_95 : f32 to vector<2x1xf32>
    %215 = arith.addf %214, %213 : vector<2x1xf32>
    %216 = arith.divf %214, %215 : vector<2x1xf32>
    %c0_96 = arith.constant 0 : index
    %c0_97 = arith.constant 0 : index
    %217 = vector.load %arg24[%c0_96, %c0_97] : memref<2x1xf32, #tpu.memory_space<vmem>>, vector<2x1xf32>
    tpu.vector_store %arg24[%c0_96, %c0_97], %216 {strides = array<i32>} : memref<2x1xf32, #tpu.memory_space<vmem>>, vector<2x1xf32>,
    return
  }
  func.func @transform_0(%arg0: i32) -> (i32, i32, i32) {
    %c0_i32 = arith.constant 0 : i32
    %c0_i32_0 = arith.constant 0 : i32
    %c0_i32_1 = arith.constant 0 : i32
    return %arg0, %c0_i32, %c0_i32_0 : i32, i32, i32
  }
  func.func @transform_1(%arg0: i32) -> (i32, i32, i32) {
    %c0_i32 = arith.constant 0 : i32
    %c0_i32_0 = arith.constant 0 : i32
    %c0_i32_1 = arith.constant 0 : i32
    return %arg0, %c0_i32, %c0_i32_0 : i32, i32, i32
  }
  func.func @transform_2(%arg0: i32) -> (i32, i32) {
    %c0_i32 = arith.constant 0 : i32
    %c0_i32_0 = arith.constant 0 : i32
    %c0_i32_1 = arith.constant 0 : i32
    return %c0_i32, %c0_i32_0 : i32, i32
  }
  func.func @transform_3(%arg0: i32) -> (i32, i32) {
    %c0_i32 = arith.constant 0 : i32
    %c0_i32_0 = arith.constant 0 : i32
    %c0_i32_1 = arith.constant 0 : i32
    return %c0_i32, %c0_i32_0 : i32, i32
  }
  func.func @transform_4(%arg0: i32) -> (i32, i32) {
    %c0_i32 = arith.constant 0 : i32
    %c0_i32_0 = arith.constant 0 : i32
    %c0_i32_1 = arith.constant 0 : i32
    return %c0_i32, %c0_i32_0 : i32, i32
  }
  func.func @transform_5(%arg0: i32) -> (i32, i32) {
    %c0_i32 = arith.constant 0 : i32
    %c0_i32_0 = arith.constant 0 : i32
    %c0_i32_1 = arith.constant 0 : i32
    return %c0_i32, %c0_i32_0 : i32, i32
  }
  func.func @transform_6(%arg0: i32) -> (i32, i32) {
    %c0_i32 = arith.constant 0 : i32
    %c0_i32_0 = arith.constant 0 : i32
    %c0_i32_1 = arith.constant 0 : i32
    return %c0_i32, %c0_i32_0 : i32, i32
  }
  func.func @transform_7(%arg0: i32) -> (i32, i32) {
    %c0_i32 = arith.constant 0 : i32
    %c0_i32_0 = arith.constant 0 : i32
    %c0_i32_1 = arith.constant 0 : i32
    return %c0_i32, %c0_i32_0 : i32, i32
  }
  func.func @transform_8(%arg0: i32) -> (i32, i32) {
    %c0_i32 = arith.constant 0 : i32
    %c0_i32_0 = arith.constant 0 : i32
    %c0_i32_1 = arith.constant 0 : i32
    return %c0_i32, %c0_i32_0 : i32, i32
  }
  func.func @transform_9(%arg0: i32) -> (i32, i32) {
    %c0_i32 = arith.constant 0 : i32
    %c0_i32_0 = arith.constant 0 : i32
    %c0_i32_1 = arith.constant 0 : i32
    return %c0_i32, %c0_i32_0 : i32, i32
  }
  func.func @transform_10(%arg0: i32) -> (i32, i32) {
    %c0_i32 = arith.constant 0 : i32
    %c0_i32_0 = arith.constant 0 : i32
    %c0_i32_1 = arith.constant 0 : i32
    return %c0_i32, %c0_i32_0 : i32, i32
  }
  func.func @transform_11(%arg0: i32) -> (i32, i32) {
    %c0_i32 = arith.constant 0 : i32
    %c0_i32_0 = arith.constant 0 : i32
    %c0_i32_1 = arith.constant 0 : i32
    return %c0_i32, %c0_i32_0 : i32, i32
  }
  func.func @transform_12(%arg0: i32) -> (i32, i32) {
    %c0_i32 = arith.constant 0 : i32
    %c0_i32_0 = arith.constant 0 : i32
    %c0_i32_1 = arith.constant 0 : i32
    return %c0_i32, %c0_i32_0 : i32, i32
  }
  func.func @transform_13(%arg0: i32) -> (i32, i32) {
    %c0_i32 = arith.constant 0 : i32
    %c0_i32_0 = arith.constant 0 : i32
    %c0_i32_1 = arith.constant 0 : i32
    return %c0_i32, %c0_i32_0 : i32, i32
  }
  func.func @transform_14(%arg0: i32) -> (i32, i32) {
    %c0_i32 = arith.constant 0 : i32
    %c0_i32_0 = arith.constant 0 : i32
    %c0_i32_1 = arith.constant 0 : i32
    return %c0_i32, %c0_i32_0 : i32, i32
  }
  func.func @transform_15(%arg0: i32) -> (i32, i32) {
    %c0_i32 = arith.constant 0 : i32
    %c0_i32_0 = arith.constant 0 : i32
    %c0_i32_1 = arith.constant 0 : i32
    return %c0_i32, %c0_i32_0 : i32, i32
  }
  func.func @transform_16(%arg0: i32) -> (i32, i32) {
    %c0_i32 = arith.constant 0 : i32
    %c0_i32_0 = arith.constant 0 : i32
    %c0_i32_1 = arith.constant 0 : i32
    return %c0_i32, %c0_i32_0 : i32, i32
  }
  func.func @transform_17(%arg0: i32) -> (i32, i32) {
    %c0_i32 = arith.constant 0 : i32
    %c0_i32_0 = arith.constant 0 : i32
    %c0_i32_1 = arith.constant 0 : i32
    return %c0_i32, %c0_i32_0 : i32, i32
  }
  func.func @transform_18(%arg0: i32) -> (i32, i32) {
    %c0_i32 = arith.constant 0 : i32
    %c0_i32_0 = arith.constant 0 : i32
    %c0_i32_1 = arith.constant 0 : i32
    return %c0_i32, %c0_i32_0 : i32, i32
  }
  func.func @transform_19(%arg0: i32) -> (i32, i32) {
    %c0_i32 = arith.constant 0 : i32
    %c0_i32_0 = arith.constant 0 : i32
    %c0_i32_1 = arith.constant 0 : i32
    return %c0_i32, %c0_i32_0 : i32, i32
  }
  func.func @transform_20(%arg0: i32) -> (i32, i32) {
    %c0_i32 = arith.constant 0 : i32
    %c0_i32_0 = arith.constant 0 : i32
    %c0_i32_1 = arith.constant 0 : i32
    return %c0_i32, %c0_i32_0 : i32, i32
  }
  func.func @transform_21(%arg0: i32) -> (i32, i32) {
    %c0_i32 = arith.constant 0 : i32
    %c0_i32_0 = arith.constant 0 : i32
    %c0_i32_1 = arith.constant 0 : i32
    return %c0_i32, %c0_i32_0 : i32, i32
  }
  func.func @transform_22(%arg0: i32) -> (i32, i32) {
    %c0_i32 = arith.constant 0 : i32
    %c0_i32_0 = arith.constant 0 : i32
    return %arg0, %c0_i32 : i32, i32
  }
  func.func @transform_23(%arg0: i32) -> (i32, i32) {
    %c0_i32 = arith.constant 0 : i32
    %c0_i32_0 = arith.constant 0 : i32
    return %arg0, %c0_i32 : i32, i32
  }
}

</mosaic_0001>

<bundles_post_ra>
// kernel: tpu_custom_call.1
= control target key start
LH: loop header
LB: loop body
LE: loop exit
PB: predicated region body
PF: predicated region fallthrough
CT: control target
= control target key end

     0   :  { %s4106_s0 = inlined_call_operand.hbm [shape: f32[2,8,64], index: 0, kind: input, shape index: {}]   ;;  %s4107_s1 = inlined_call_operand.hbm [shape: bf16[2,8,768], index: 1, kind: input, shape index: {}]   ;;  %s4108_s2 = inlined_call_operand.vmem [shape: f32[64,64], index: 2, kind: input, shape index: {}]   ;;  %s4109_s3 = inlined_call_operand.vmem [shape: f32[1,64], index: 3, kind: input, shape index: {}]   ;;  %s4110_s4 = inlined_call_operand.hbm [shape: bf16[768,128], index: 4, kind: input, shape index: {}]   ;;  %s4111_s5 = inlined_call_operand.vmem [shape: f32[1,128], index: 5, kind: input, shape index: {}]   ;;  %s4112_s6 = inlined_call_operand.vmem [shape: f32[64,64], index: 6, kind: input, shape index: {}]   ;;  %s4113_s7 = inlined_call_operand.vmem [shape: f32[1,64], index: 7, kind: input, shape index: {}]   ;;  %s4114_s8 = inlined_call_operand.vmem [shape: f32[1,64], index: 8, kind: input, shape index: {}]   ;;  %s4115_s9 = inlined_call_operand.vmem [shape: f32[1,64], index: 9, kind: input, shape index: {}]   ;;  %s4116_s10 = inlined_call_operand.vmem [shape: f32[128,64], index: 10, kind: input, shape index: {}]   ;;  %s4117_s11 = inlined_call_operand.vmem [shape: f32[1,64], index: 11, kind: input, shape index: {}]   ;;  %s4118_s12 = inlined_call_operand.vmem [shape: f32[1,64], index: 12, kind: input, shape index: {}]   ;;  %s4119_s13 = inlined_call_operand.vmem [shape: f32[1,64], index: 13, kind: input, shape index: {}]   ;;  %s4120_s14 = inlined_call_operand.vmem [shape: f32[1,64], index: 14, kind: input, shape index: {}]   ;;  %s4121_s15 = inlined_call_operand.<no memory space> [shape: f32[1,1], index: 15, kind: input, shape index: {}]   ;;  %s4122_s16 = inlined_call_operand.vmem [shape: f32[64,64], index: 16, kind: input, shape index: {}]   ;;  %s4123_s17 = inlined_call_operand.vmem [shape: f32[1,64], index: 17, kind: input, shape index: {}]   ;;  %s4124_s18 = inlined_call_operand.vmem [shape: f32[1,64], index: 18, kind: input, shape index: {}]   ;;  %s4125_s19 = inlined_call_operand.vmem [shape: f32[1,64], index: 19, kind: input, shape index: {}]   ;;  %s4126_s20 = inlined_call_operand.vmem [shape: f32[1,64], index: 20, kind: input, shape index: {}]   ;;  %s4127_s22 = inlined_call_operand.hbm [shape: f32[2,8], index: 22, kind: output, shape index: {0}]   ;;  %s4128_s23 = inlined_call_operand.vmem [shape: f32[2,1], index: 23, kind: output, shape index: {1}]   ;;  %s4129_s21 = inlined_call_operand.<no memory space> [shape: f32[1,1], index: 21, kind: input, shape index: {}]  }
   0x1   :  { %4132 = sst [smem:[#allocation14_spill]] %s4106_s0  ;;  %v29_v0 = vstv %s4121_s15  ;;  %v31_v1 = vstv %s4129_s21 }
   0x2   :  { %4133 = sst [smem:[#allocation15_spill]] %s4107_s1  ;;  %30 = vst [vmem:[#allocation2] sm:$0x1] %v29_v0  ;;  %32 = vst [vmem:[#allocation3] sm:$0x1] %v31_v1 }
   0x3   :  { %4134 = sst [smem:[#allocation16_spill]] %s4108_s2 }
   0x4   :  { %4135 = sst [smem:[#allocation17_spill]] %s4109_s3 }
   0x5   :  { %4136 = sst [smem:[#allocation18_spill]] %s4110_s4 }
   0x6   :  { %4137 = sst [smem:[#allocation19_spill]] %s4111_s5 }
   0x7   :  { %4138 = sst [smem:[#allocation20_spill]] %s4112_s6 }
   0x8   :  { %4139 = sst [smem:[#allocation21_spill]] %s4113_s7 }
   0x9   :  { %33 = vsyncpa [#allocation5], 0 }
   0xa   :  { %34 = vsyncpa [#allocation8], 0 }
   0xb   :  { %35 = vsyncpa [#allocation6], 0  ;;  %s3573_s5 = smov [#allocation7]  }
   0xc   :  { %s53_s1 = sshll.u32 %s3573_s5, 4  ;;  %s54_s1 = int_to_ptr.vmem [resolvable:$true] %s53_s1 }
   0xd   :  { %s3495_s26 = scalar_lea.vmem %s54_s1, 768  ;;  %p3500_p1 = scmp.lt.s32.totalorder %s54_s1, %s54_s1 }
   0xe   :  { %p3496_p0 = scmp.ne.s32.totalorder %s54_s1, %s3495_s26  ;;  %p3501_p2 = scmp.lt.s32.totalorder %s3495_s26, %s3495_s26 }
  0x10   :  { %p3502_p3 = por %p3501_p2, %p3500_p1 }
  0x12   :  { %p3503_p4 = pnand %p3502_p3, %p3496_p0 }
  0x14   :  { %3506 = shalt.err (!%p3503_p4)
}
  0x15   :  { %s3574_s15 = smov 384   ;;  %s3575_s2 = smov 24  }
  0x16   :  { %s4140_s21 = sld [smem:[#allocation15_spill]]  ;;  %s3576_s7 = smov [#allocation4]  }
  0x17   :  { %s41_s28 = sshll.u32 %s3576_s7, 4  ;;  %s42_s28 = int_to_ptr.vmem [resolvable:$true] %s41_s28 }
  0x18   :  { %s3515_s29 = scalar_lea.vmem %s42_s28, 256  ;;  %p3520_p6 = scmp.lt.s32.totalorder %s42_s28, %s42_s28 }
  0x19   :  { %p3516_p5 = scmp.ne.s32.totalorder %s42_s28, %s3515_s29  ;;  %p3521_p7 = scmp.lt.s32.totalorder %s3515_s29, %s3515_s29 }
  0x1b   :  { %p3522_p8 = por %p3521_p7, %p3520_p6 }
  0x1c   :  { %59 = dma.hbm_to_vmem [thread:$0]  %s4140_s21, 768, %s54_s1, [#allocation8], %s3574_s15, %s3574_s15, %s3575_s2  }
  0x1d   :  { %p3523_p9 = pnand %p3522_p8, %p3516_p5 }
  0x1f   :  { %3526 = shalt.err (!%p3523_p9)
}
  0x20   :  { %s3577_s3 = smov 128   ;;  %s3578_s0 = smov 8  }
  0x21   :  { %s4141_s24 = sld [smem:[#allocation14_spill]]  ;;  %s3579_s25 = smov [#allocation9]  }
  0x22   :  { %s69_s5 = sshll.u32 %s3579_s25, 4  ;;  %s70_s5 = int_to_ptr.vmem [resolvable:$true] %s69_s5 }
  0x23   :  { %s3535_s1 = scalar_lea.vmem %s70_s5, 6144  ;;  %p3540_p11 = scmp.lt.s32.totalorder %s70_s5, %s70_s5 }
  0x24   :  { %p3536_p10 = scmp.ne.s32.totalorder %s70_s5, %s3535_s1  ;;  %p3541_p12 = scmp.lt.s32.totalorder %s3535_s1, %s3535_s1 }
  0x26   :  { %p3542_p13 = por %p3541_p12, %p3540_p11 }
  0x27   :  { %47 = dma.hbm_to_vmem [thread:$0]  %s4141_s24, 256, %s42_s28, [#allocation5], %s3577_s3, %s3577_s3, %s3578_s0  }
  0x28   :  { %p3543_p0 = pnand %p3542_p13, %p3536_p10 }
  0x2a   :  { %3546 = shalt.err (!%p3543_p0)
}
  0x2b   :  { %s3580_s26 = smov 64   ;;  %s3581_s15 = smov 4  }
  0x2c   :  { %s4142_s27 = sld [smem:[#allocation18_spill]] }
  0x32   :  { %75 = dma.hbm_to_vmem [thread:$0]  %s4142_s27, 6144, %s70_s5, [#allocation8], %s3580_s26, %s3580_s26, %s3581_s15  }
  0x33   :  { %3567 = dma.done.wait [#allocation5], 256  }
  0x34   :  { %3568 = vsyncadd [#allocation5], 4294967040 }
  0x35   :  { %3569 = dma.done.wait [#allocation8], 6912  }
  0x36   :  { %3570 = vsyncadd [#allocation8], 4294960384  ;;  %s4143_s28 = sld [smem:[#allocation16_spill]]  ;;  %v3382_v4 = vld [vmem:[#allocation9 + $0x78] sm:$0xff]   ;;  %v3384_v8 = vld [vmem:[#allocation9 + $0x70] sm:$0xff]   ;;  %vm143_vm0 = vcmask 523264  }
  0x37   :  { %v3383_v5 = vld [vmem:[#allocation9 + $0x38] sm:$0xff]   ;;  %3035 = vmatprep.subr.bf16.mxu1 %v3382_v4  ;;  %v3385_v9 = vld [vmem:[#allocation9 + $0x30] sm:$0xff]   ;;  %v3386_v11 = vld [vmem:[#allocation9 + $0x68] sm:$0xff]   ;;  %vm3583_vm1 = vmmov 0   ;;  %s4144_s29 = sld [smem:[#allocation19_spill]]  ;;  %vm771_vm2 = vcmask 130048  }
  0x38   :  { %3036 = vmatpush3.bf16.msra.mxu1 %v3383_v5  ;;  %v3387_v13 = vld [vmem:[#allocation9 + $0x28] sm:$0xff]   ;;  %v3388_v15 = vld [vmem:[#allocation9 + $0x60] sm:$0xff]   ;;  %v3390_v19 = vld [vmem:[#allocation9 + $0xf8] sm:$0xff]   ;;  %s4145_s4 = sld [smem:[#allocation17_spill]]  ;;  %s3584_s30 = smov 112   ;;  %vm924_vm3 = vcmask 64512  }
  0x39   :  { %3037 = vmatprep.subr.bf16.mxu1 %v3384_v8  ;;  %v3389_v17 = vld [vmem:[#allocation9 + $0x20] sm:$0xff]   ;;  %v121_v20 = vld [vmem:[#allocation4 + $0x8] sm:$0xff]  ;;  %v3391_v21 = vld [vmem:[#allocation9 + $0xb8] sm:$0xff]   ;;  %s3586_s24 = smov 96   ;;  %s4146_s1 = sld [smem:[#allocation20_spill]]  ;;  %vm2662_vm4 = vcmask 1041409  }
  0x3a   :  { %v120_v18 = vld [vmem:[#allocation4] sm:$0xff]  ;;  %v3392_v22 = vld [vmem:[#allocation9 + $0x58] sm:$0xff]   ;;  %v3394_v24 = vld [vmem:[#allocation9 + $0xf0] sm:$0xff]   ;;  %s4147_s6 = sld [smem:[#allocation21_spill]]  ;;  %vm2842_vm5 = vcmask 517120   ;;  %vm2665_vm6 = vcmask 58368  }
  0x3b   :  { %3193 = vmatprep.mubr.msk.f32.mxu0 %vm143_vm0, %v120_v18  ;;  %v3393_v23 = vld [vmem:[#allocation9 + $0x18] sm:$0xff]   ;;  %v3395_v25 = vld [vmem:[#allocation9 + $0xb0] sm:$0xff]   ;;  %v3398_v28 = vld [vmem:[#allocation9 + $0xe8] sm:$0xff]  }
  0x3c   :  { %v135_v2 = vld [vmem:[%s4143_s28 + $0x38] sm:$0xff]  ;;  %v134_v3 = vld [vmem:[%s4143_s28 + $0x30] sm:$0xff]  ;;  %v133_v6 = vld [vmem:[%s4143_s28 + $0x28] sm:$0xff]  ;;  %3038 = vmatpush3.bf16.msra.mxu1 %v3385_v9 }
  0x3d   :  { %3177 = vmatprep.subr.mxu0 %v135_v2  ;;  %v132_v7 = vld [vmem:[%s4143_s28 + $0x20] sm:$0xff]  ;;  %v131_v10 = vld [vmem:[%s4143_s28 + $0x18] sm:$0xff]  ;;  %v130_v12 = vld [vmem:[%s4143_s28 + $0x10] sm:$0xff]  ;;  %3039 = vmatprep.subr.bf16.mxu1 %v3386_v11 }
  0x3e   :  { %3178 = vmatpush3.msra.mxu0 %v135_v2  ;;  %v129_v14 = vld [vmem:[%s4143_s28 + $0x8] sm:$0xff]  ;;  %v128_v16 = vld [vmem:[%s4143_s28] sm:$0xff]  ;;  %v3396_v26 = vld [vmem:[#allocation9 + $0x50] sm:$0xff]   ;;  %v3582_v2 = vmov 0.0   ;;  %s3587_s28 = smov 32  }
  0x3f   :  { %3179 = vmatprep.subr.mxu0 %v134_v3  ;;  %v3397_v27 = vld [vmem:[#allocation9 + $0x10] sm:$0xff]   ;;  %v3399_v29 = vld [vmem:[#allocation9 + $0xa8] sm:$0xff]   ;;  %v3402_v32 = vld [vmem:[#allocation9 + $0xe0] sm:$0xff]  }
  0x40   :  { %3180 = vmatpush3.msra.mxu0 %v134_v3  ;;  %3040 = vmatpush3.bf16.msra.mxu1 %v3387_v13  ;;  %v3400_v30 = vld [vmem:[#allocation9 + $0x48] sm:$0xff]   ;;  %v3403_v33 = vld [vmem:[#allocation9 + $0xa0] sm:$0xff]   ;;  %v3406_v36 = vld [vmem:[#allocation9 + $0xd8] sm:$0xff]  }
  0x41   :  { %3181 = vmatprep.subr.mxu0 %v133_v6  ;;  %3041 = vmatprep.subr.bf16.mxu1 %v3388_v15  ;;  %v3401_v31 = vld [vmem:[#allocation9 + $0x8] sm:$0xff]   ;;  %v3404_v34 = vld [vmem:[#allocation9 + $0x40] sm:$0xff]   ;;  %v3410_v39 = vld [vmem:[#allocation9 + $0x98] sm:$0xff]  }
  0x42   :  { %3182 = vmatpush3.msra.mxu0 %v133_v6  ;;  %v3405_v35 = vld [vmem:[#allocation9] sm:$0xff]   ;;  %v3407_v37 = vld [vmem:[#allocation7] ss:$24 sps:$4 sm:$0xff]   ;;  %v3409_v38 = vld [vmem:[#allocation7 + $0x4] ss:$24 sps:$4 sm:$0xff]  }
  0x43   :  { %3183 = vmatprep.subr.mxu0 %v132_v7  ;;  %680 = vmatprep.mubr.bf16.mxu1 %v3409_v38  ;;  %v3411_v40 = vld [vmem:[#allocation9 + $0x178] sm:$0xff]   ;;  %v3413_v42 = vld [vmem:[#allocation9 + $0xd0] sm:$0xff]   ;;  %v3417_v46 = vld [vmem:[#allocation9 + $0xc8] sm:$0xff]  }
  0x44   :  { %3184 = vmatpush3.msra.mxu0 %v132_v7  ;;  %3042 = vmatpush3.bf16.msra.mxu1 %v3389_v17  ;;  %v3412_v41 = vld [vmem:[#allocation9 + $0x138] sm:$0xff]   ;;  %v3414_v43 = vld [vmem:[#allocation9 + $0x90] sm:$0xff]   ;;  %v3418_v47 = vld [vmem:[#allocation9 + $0x88] sm:$0xff]  }
  0x45   :  { %3185 = vmatprep.subr.mxu0 %v131_v10  ;;  %3043 = vmatprep.subr.bf16.mxu1 %v3392_v22  ;;  %v3415_v44 = vld [vmem:[#allocation9 + $0x170] sm:$0xff]   ;;  %v3419_v48 = vld [vmem:[#allocation9 + $0x168] sm:$0xff]   ;;  %v3421_v50 = vld [vmem:[#allocation9 + $0xc0] sm:$0xff]  }
  0x46   :  { %3186 = vmatpush3.msra.mxu0 %v131_v10  ;;  %v3416_v45 = vld [vmem:[#allocation9 + $0x130] sm:$0xff]   ;;  %v3420_v49 = vld [vmem:[#allocation9 + $0x128] sm:$0xff]   ;;  %v3422_v51 = vld [vmem:[#allocation9 + $0x80] sm:$0xff]  }
  0x47   :  { %3187 = vmatprep.subr.mxu0 %v130_v12  ;;  %v3423_v52 = vld [vmem:[#allocation9 + $0x160] sm:$0xff]   ;;  %v3424_v53 = vld [vmem:[#allocation7 + $0x8] ss:$24 sps:$4 sm:$0xff]   ;;  %v3426_v54 = vld [vmem:[#allocation7 + $0xc] ss:$24 sps:$4 sm:$0xff]  }
  0x48   :  { %3188 = vmatpush3.msra.mxu0 %v130_v12  ;;  %3044 = vmatpush3.bf16.msra.mxu1 %v3393_v23  ;;  %v3427_v55 = vld [vmem:[#allocation9 + $0x120] sm:$0xff]   ;;  %v3428_v56 = vld [vmem:[#allocation9 + $0x158] sm:$0xff]   ;;  %v3430_v58 = vld [vmem:[#allocation9 + $0x150] sm:$0xff]  }
  0x49   :  { %3189 = vmatprep.subr.mxu0 %v129_v14  ;;  %3045 = vmatprep.subr.bf16.mxu1 %v3396_v26  ;;  %v3429_v57 = vld [vmem:[#allocation9 + $0x118] sm:$0xff]   ;;  %v3431_v59 = vld [vmem:[#allocation9 + $0x110] sm:$0xff]   ;;  %v3432_v60 = vld [vmem:[#allocation9 + $0x148] sm:$0xff]  }
  0x4a   :  { %3190 = vmatpush3.msra.mxu0 %v129_v14  ;;  %v3438_v61 = vld [vmem:[#allocation7 + $0x14] ss:$24 sps:$4 sm:$0xff]   ;;  %v3433_v62 = vld [vmem:[#allocation9 + $0x108] sm:$0xff]   ;;  %v3436_v1 = vld [vmem:[#allocation7 + $0x10] ss:$24 sps:$4 sm:$0xff]  }
  0x4b   :  { %3191 = vmatprep.subr.mxu0 %v128_v16  ;;  %v3434_v63 = vld [vmem:[#allocation9 + $0x140] sm:$0xff]   ;;  %v2920_v12 = vld [vmem:[%s4144_s29] ss:$0 sm:$0xff]  ;;  %s3588_s29 = smov 80  }
  0x4c   :  { %3192 = vmatpush3.msra.mxu0 %v128_v16  ;;  %3046 = vmatpush3.bf16.msra.mxu1 %v3397_v27  ;;  %v3435_v0 = vld [vmem:[#allocation9 + $0x100] sm:$0xff]   ;;  %v2917_v17 = vld [vmem:[%s4145_s4] ss:$0 sm:$0xff] }
  0x4d   :  { %3057 = vmatprep.subr.bf16.mxu0 %v3390_v19  ;;  %3194 = vmatmul.mubr.msk.f32.vlgmr.msra.gmra.mxu0 %vm143_vm0, %v121_v20 }
  0x4e   :  { %3058 = vmatpush3.bf16.msra.mxu0 %v3391_v21  ;;  %3047 = vmatprep.subr.bf16.mxu1 %v3400_v30 }
  0x4f   :  { %3059 = vmatprep.subr.bf16.mxu0 %v3394_v24  ;;  %721 = vmatprep.mubr.bf16.mxu0 %v3426_v54 }
  0x50   :  { %3048 = vmatpush3.bf16.msra.mxu1 %v3401_v31 }
  0x51   :  { %3049 = vmatprep.subr.bf16.mxu1 %v3404_v34 }
  0x52   :  { %3060 = vmatpush3.bf16.msra.mxu0 %v3395_v25 }
  0x53   :  { %3061 = vmatprep.subr.bf16.mxu0 %v3398_v28 }
  0x54   :  { %3050 = vmatpush3.bf16.msra.mxu1 %v3405_v35 }
  0x55   :  { %3079 = vmatprep.subr.bf16.mxu1 %v3411_v40 }
  0x56   :  { %3062 = vmatpush3.bf16.msra.mxu0 %v3399_v29 }
  0x57   :  { %3063 = vmatprep.subr.bf16.mxu0 %v3402_v32  ;;  %681 = vmatmul.mubr.bf16.vlgmr.msra.gmra.mxu1 %v3407_v37 }
  0x58   :  { %3080 = vmatpush3.bf16.msra.mxu1 %v3412_v41  ;;  %762 = vmatprep.mubr.bf16.mxu1 %v3438_v61 }
  0x59   :  { %3081 = vmatprep.subr.bf16.mxu1 %v3415_v44 }
  0x5a   :  { %3064 = vmatpush3.bf16.msra.mxu0 %v3403_v33 }
  0x5b   :  { %3065 = vmatprep.subr.bf16.mxu0 %v3406_v36 }
  0x5c   :  { %3082 = vmatpush3.bf16.msra.mxu1 %v3416_v45 }
  0x5d   :  { %3083 = vmatprep.subr.bf16.mxu1 %v3419_v48 }
  0x5e   :  { %3066 = vmatpush3.bf16.msra.mxu0 %v3410_v39 }
  0x5f   :  { %3067 = vmatprep.subr.bf16.mxu0 %v3413_v42 }
  0x60   :  { %3084 = vmatpush3.bf16.msra.mxu1 %v3420_v49 }
  0x61   :  { %3085 = vmatprep.subr.bf16.mxu1 %v3423_v52 }
  0x62   :  { %3068 = vmatpush3.bf16.msra.mxu0 %v3414_v43 }
  0x63   :  { %3069 = vmatprep.subr.bf16.mxu0 %v3417_v46 }
  0x64   :  { %3086 = vmatpush3.bf16.msra.mxu1 %v3427_v55 }
  0x65   :  { %3087 = vmatprep.subr.bf16.mxu1 %v3428_v56 }
  0x66   :  { %3070 = vmatpush3.bf16.msra.mxu0 %v3418_v47 }
  0x67   :  { %3071 = vmatprep.subr.bf16.mxu0 %v3421_v50 }
  0x68   :  { %3088 = vmatpush3.bf16.msra.mxu1 %v3429_v57 }
  0x69   :  { %3089 = vmatprep.subr.bf16.mxu1 %v3430_v58 }
  0x6a   :  { %3072 = vmatpush3.bf16.msra.mxu0 %v3422_v51 }
  0x6b   :  { %3206 = vmatprep.subr.mxu0 %v3582_v2 }
  0x6c   :  { %3090 = vmatpush3.bf16.msra.mxu1 %v3431_v59 }
  0x6d   :  { %722 = vmatmul.mubr.bf16.vlgmr.msra.gmra.mxu0 %v3424_v53  ;;  %3091 = vmatprep.subr.bf16.mxu1 %v3432_v60 }
  0x6e   :  { %3208 = vmatprep.mubr.msk.f32.mxu0 %vm3583_vm1, %v3582_v2 }
  0x70   :  { %3092 = vmatpush3.bf16.msra.mxu1 %v3433_v62 }
  0x71   :  { %3093 = vmatprep.subr.bf16.mxu1 %v3434_v63 }
  0x74   :  { %3094 = vmatpush3.bf16.msra.mxu1 %v3435_v0 }
  0x75   :  { %3196 = vmatprep.subr.mxu1 %v3582_v2 }
  0x77   :  { %763 = vmatmul.mubr.bf16.vlgmr.msra.gmra.mxu1 %v3436_v1 }
  0x78   :  { %3198 = vmatprep.mubr.msk.f32.mxu1 %vm3583_vm1, %v3582_v2 }
 0x10d   :  { %v3195_v3 = vpop.f32.mrf.mxu0 }
 0x10e   :  { %v222_v31 = vadd.f32 %v3195_v3, %v2917_v17 }
 0x10f   :  { %v216_v4 = vpop.f32.mrf.mxu0 }
 0x110   :  { %v217_v24 = vadd.f32 %v2917_v17, %v216_v4  ;;  %v3782_v34 = vmul.f32 0.25, %v222_v31 }
 0x112   :  { %v3771_v32 = vmul.f32 0.25, %v217_v24 }
 0x117   :  { %v3051_v5 = vpop.f32.mrf.mxu1 }
 0x119   :  { %v3052_v7 = vpop.f32.mrf.mxu1 }
 0x11a   :  { %v3053_v11 = vadd.f32 %v3052_v7, %v3051_v5 }
 0x11b   :  { %v3054_v9 = vpop.f32.mrf.mxu1 }
 0x11c   :  { %v683_v18 = vadd.f32 %v3053_v11, %v2920_v12 }
 0x11d   :  { %v3055_v13 = vpop.f32.mrf.mxu1 }
 0x11e   :  { %v3056_v19 = vadd.f32 %v3055_v13, %v3054_v9 }
 0x120   :  { %v686_v26 = vadd.f32 %v3056_v19, %v2920_v12 }
 0x12d   :  { %v3073_v6 = vpop.f32.mrf.mxu0 }
 0x12f   :  { %v3074_v8 = vpop.f32.mrf.mxu0 }
 0x130   :  { %v3075_v14 = vadd.f32 %v3074_v8, %v3073_v6 }
 0x131   :  { %v3076_v10 = vpop.f32.mrf.mxu0 }
 0x132   :  { %v724_v21 = vadd.f32 %v3075_v14, %v683_v18 }
 0x133   :  { %v3077_v15 = vpop.f32.mrf.mxu0 }
 0x134   :  { %v3078_v22 = vadd.f32 %v3077_v15, %v3076_v10 }
 0x136   :  { %v727_v29 = vadd.f32 %v3078_v22, %v686_v26 }
 0x137   :  { %v3095_v16 = vpop.f32.mrf.mxu1 }
 0x139   :  { %v3096_v20 = vpop.f32.mrf.mxu1 }
 0x13a   :  { %v3097_v23 = vadd.f32 %v3096_v20, %v3095_v16 }
 0x13b   :  { %v3098_v25 = vpop.f32.mrf.mxu1 }
 0x13c   :  { %v3767_v27 = vadd.f32 %v3097_v23, %v724_v21  ;;  %v1100_v21 = vld [vmem:[%s4146_s1 + $0x8] sm:$0xff] }
 0x13d   :  { %v3099_v28 = vpop.f32.mrf.mxu1 }
 0x13e   :  { %v3100_v30 = vadd.f32 %v3099_v28, %v3098_v25  ;;  %3197 = vmatpush3.xpose.msk.msra.mxu1 %vm771_vm2, %v3767_v27  ;;  %v1099_v28 = vld [vmem:[%s4146_s1] sm:$0xff] }
 0x13f   :  { %3201 = vmatprep.subr.mxu1 %v3582_v2 }
 0x140   :  { %v3774_v33 = vadd.f32 %v3100_v30, %v727_v29 }
 0x141   :  { %3199 = vmatmul.mubr.msk.f32.vlgmr.msra.gmra.mxu1 %vm771_vm2, %v3771_v32 }
 0x142   :  { %1023 = vrot.lane.b32.xlu1 %v3774_v33, %s3580_s26  ;;  %3202 = vmatpush3.xpose.msk.msra.mxu1 %vm771_vm2, %v3774_v33 }
 0x143   :  { %3203 = vmatprep.mubr.msk.f32.mxu1 %vm3583_vm1, %v3582_v2  ;;  %3221 = vmatprep.subr.mxu1 %v3582_v2 }
 0x145   :  { %3204 = vmatmul.mubr.msk.f32.vlgmr.msra.gmra.mxu1 %vm771_vm2, %v3782_v34 }
 0x146   :  { %1103 = vrot.lane.b32.xlu1 %v3767_v27, %s3584_s30  ;;  %3223 = vmatprep.mubr.msk.f32.mxu1 %vm3583_vm1, %v3582_v2 }
 0x14a   :  { %1181 = vrot.lane.b32.xlu1 %v3774_v33, %s3584_s30 }
 0x1b4   :  { %v1024_v35 = vpop.permute.xlu1 %1023 }
 0x1b8   :  { %v1104_v36 = vpop.permute.xlu1 %1103 }
 0x1bc   :  { %v1182_v37 = vpop.permute.xlu1 %1181 }
 0x1bd   :  { %3222 = vmatpush3.xpose.msk.msra.mxu1 %vm771_vm2, %v1182_v37  ;;  %v1432_v37 = vld [vmem:[%s4146_s1 + $0x18] sm:$0xff] }
 0x1be   :  { %3231 = vmatprep.subr.mxu1 %v3582_v2 }
 0x201   :  { %v844_v38 = vpop.f32.mrf.mxu1 }
 0x202   :  { %v925_v39 = vsel %vm924_vm3, %v844_v38, -inf }
 0x203   :  { %926 = vmax.xlane.f32.xlu0 %v925_v39  ;;  %v3200_v40 = vpop.f32.mrf.mxu1 }
 0x205   :  { %v920_v41 = vpop.f32.mrf.mxu1 }
 0x206   :  { %v928_v42 = vsel %vm924_vm3, %v920_v41, -inf }
 0x207   :  { %929 = vmax.xlane.f32.xlu0 %v928_v42  ;;  %v3205_v43 = vpop.f32.mrf.mxu1 }
 0x21d   :  { %947 = vrot.lane.b32.xlu0 %v3767_v27, %s3580_s26  ;;  %s3585_s26 = smov 48  }
 0x221   :  { %1101 = vrot.lane.b32.xlu0 %v3771_v32, %s3584_s30 }
 0x28c   :  { %v927_v44 = vpop.xlane.xlu0 %926 }
 0x28d   :  { %v931_v45 = vsub.f32 %v844_v38, %v927_v44  ;;  %v1431_v38 = vld [vmem:[%s4146_s1 + $0x10] sm:$0xff] }
 0x28f   :  { %v933_v46 = vmul.f32 1.442695, %v931_v45 }
 0x290   :  { %v930_v47 = vpop.xlane.xlu0 %929 }
 0x291   :  { %3439 = vpow2.f32 %v933_v46  ;;  %v932_v48 = vsub.f32 %v920_v41, %v930_v47 }
 0x293   :  { %v935_v49 = vmul.f32 1.442695, %v932_v48 }
 0x294   :  { %v948_v50 = vpop.permute.xlu0 %947 }
 0x295   :  { %3441 = vpow2.f32 %v935_v49  ;;  %3207 = vmatpush3.msra.mxu0 %v948_v50 }
 0x296   :  { %3211 = vmatprep.subr.mxu0 %v3582_v2 }
 0x298   :  { %v1102_v62 = vpop.permute.xlu0 %1101 }
 0x29e   :  { %v3440_v51 = vpop.eup %3439 }
 0x29f   :  { %v937_v52 = vsel %vm924_vm3, %v3440_v51, 0.0 }
 0x2a0   :  { %938 = vadd.xlane.f32.xlu1 %v937_v52 }
 0x2a2   :  { %v3442_v53 = vpop.eup %3441 }
 0x2a3   :  { %v940_v54 = vsel %vm924_vm3, %v3442_v53, 0.0 }
 0x2a4   :  { %941 = vadd.xlane.f32.xlu1 %v940_v54 }
 0x2b5   :  { %1179 = vrot.lane.b32.xlu1 %v3782_v34, %s3584_s30 }
 0x329   :  { %v939_v55 = vpop.xlane.xlu1 %938 }
 0x32a   :  { %3443 = vrcp.f32 %v939_v55 }
 0x32d   :  { %v942_v56 = vpop.xlane.xlu1 %941 }
 0x32e   :  { %3445 = vrcp.f32 %v942_v56 }
 0x331   :  { %v1180_v57 = vpop.permute.xlu1 %1179 }
 0x332   :  { %3224 = vmatmul.mubr.msk.f32.vlgmr.msra.gmra.mxu1 %vm771_vm2, %v1180_v57 }
 0x333   :  { %3233 = vmatprep.mubr.msk.f32.mxu1 %vm3583_vm1, %v3582_v2 }
 0x337   :  { %v3444_v58 = vpop.eup %3443 }
 0x338   :  { %v945_v59 = vmul.f32 %v3444_v58, %v3440_v51 }
 0x33a   :  { %3209 = vmatmul.mubr.msk.f32.vlgmr.msra.gmra.mxu0 %vm924_vm3, %v945_v59 }
 0x33b   :  { %v3446_v60 = vpop.eup %3445  ;;  %3212 = vmatpush3.msra.mxu0 %v1024_v35  ;;  %3213 = vmatprep.mubr.msk.f32.mxu0 %vm3583_vm1, %v3582_v2 }
 0x33c   :  { %3216 = vmatprep.subr.mxu0 %v3582_v2  ;;  %v946_v61 = vmul.f32 %v3446_v60, %v3442_v53 }
 0x33e   :  { %3214 = vmatmul.mubr.msk.f32.vlgmr.msra.gmra.mxu0 %vm924_vm3, %v946_v61 }
 0x33f   :  { %3217 = vmatpush3.xpose.msk.msra.mxu0 %vm771_vm2, %v1104_v36  ;;  %3218 = vmatprep.mubr.msk.f32.mxu0 %vm3583_vm1, %v3582_v2 }
 0x340   :  { %3226 = vmatprep.subr.mxu0 %v3582_v2 }
 0x342   :  { %3219 = vmatmul.mubr.msk.f32.vlgmr.msra.gmra.mxu0 %vm771_vm2, %v1102_v62 }
 0x343   :  { %3228 = vmatprep.mubr.msk.f32.mxu0 %vm3583_vm1, %v3582_v2 }
 0x3f2   :  { %v1253_v63 = vpop.f32.mrf.mxu1 }
 0x3f3   :  { %v1260_v0 = vsel %vm924_vm3, %v1253_v63, -inf }
 0x3f4   :  { %1261 = vmax.xlane.f32.xlu1 %v1260_v0  ;;  %v3225_v1 = vpop.f32.mrf.mxu1 }
 0x3fa   :  { %v1019_v3 = vpop.f32.mrf.mxu0 }
 0x3fc   :  { %v3210_v4 = vpop.f32.mrf.mxu0 }
 0x3fe   :  { %v1095_v5 = vpop.f32.mrf.mxu0 }
 0x400   :  { %v3215_v6 = vpop.f32.mrf.mxu0 }
 0x402   :  { %v1175_v7 = vpop.f32.mrf.mxu0 }
 0x403   :  { %v1257_v8 = vsel %vm924_vm3, %v1175_v7, -inf }
 0x404   :  { %1258 = vmax.xlane.f32.xlu0 %v1257_v8  ;;  %v3220_v9 = vpop.f32.mrf.mxu0 }
 0x405   :  { %1355 = vrot.lane.b32.xlu1 %v3774_v33, %s3585_s26 }
 0x409   :  { %1597 = vrot.lane.b32.xlu1 %v3767_v27, %s3586_s24 }
 0x40d   :  { %1675 = vrot.lane.b32.xlu1 %v3774_v33, %s3586_s24 }
 0x411   :  { %1673 = vrot.lane.b32.xlu1 %v3782_v34, %s3586_s24 }
 0x47d   :  { %v1262_v10 = vpop.xlane.xlu1 %1261 }
 0x47e   :  { %v1264_v11 = vsub.f32 %v1253_v63, %v1262_v10 }
 0x480   :  { %v1267_v12 = vmul.f32 1.442695, %v1264_v11 }
 0x481   :  { %v1356_v13 = vpop.permute.xlu1 %1355 }
 0x482   :  { %3447 = vpow2.f32 %v1267_v12  ;;  %3232 = vmatpush3.msra.mxu1 %v1356_v13  ;;  %v1925_v12 = vld [vmem:[%s4146_s1 + $0x20] sm:$0xff] }
 0x483   :  { %3243 = vmatprep.subr.mxu1 %v1100_v21 }
 0x485   :  { %v1598_v23 = vpop.permute.xlu1 %1597 }
 0x489   :  { %v1676_v29 = vpop.permute.xlu1 %1675 }
 0x48d   :  { %v1259_v14 = vpop.xlane.xlu0 %1258  ;;  %v1674_v31 = vpop.permute.xlu1 %1673 }
 0x48e   :  { %v1263_v15 = vsub.f32 %v1175_v7, %v1259_v14 }
 0x48f   :  { %v3448_v16 = vpop.eup %3447 }
 0x490   :  { %v1265_v17 = vmul.f32 1.442695, %v1263_v15  ;;  %v1272_v18 = vsel %vm924_vm3, %v3448_v16, 0.0 }
 0x491   :  { %1273 = vadd.xlane.f32.xlu0 %v1272_v18 }
 0x492   :  { %3449 = vpow2.f32 %v1265_v17 }
 0x49f   :  { %v3450_v19 = vpop.eup %3449 }
 0x4a0   :  { %v1269_v20 = vsel %vm924_vm3, %v3450_v19, 0.0 }
 0x4a1   :  { %1270 = vadd.xlane.f32.xlu0 %v1269_v20 }
 0x4b7   :  { %1279 = vrot.lane.b32.xlu0 %v3767_v27, %s3585_s26  ;;  %s3589_s26 = smov 16  }
 0x4bb   :  { %1595 = vrot.lane.b32.xlu0 %v3771_v32, %s3586_s24 }
 0x51a   :  { %v1274_v22 = vpop.xlane.xlu0 %1273 }
 0x51b   :  { %3451 = vrcp.f32 %v1274_v22 }
 0x528   :  { %v3452_v24 = vpop.eup %3451 }
 0x529   :  { %v1278_v25 = vmul.f32 %v3452_v24, %v3448_v16 }
 0x52a   :  { %v1271_v26 = vpop.xlane.xlu0 %1270 }
 0x52b   :  { %3453 = vrcp.f32 %v1271_v26  ;;  %3234 = vmatmul.mubr.msk.f32.vlgmr.msra.gmra.mxu1 %vm924_vm3, %v1278_v25 }
 0x52c   :  { %3244 = vmatpush3.msra.mxu1 %v1100_v21  ;;  %3247 = vmatprep.mubr.msk.f32.mxu1 %vm771_vm2, %v1019_v3 }
 0x52d   :  { %3245 = vmatprep.subr.mxu1 %v1099_v28 }
 0x52e   :  { %3246 = vmatpush3.msra.mxu1 %v1099_v28  ;;  %v1280_v30 = vpop.permute.xlu0 %1279 }
 0x52f   :  { %3255 = vmatprep.subr.mxu1 %v3582_v2  ;;  %3227 = vmatpush3.msra.mxu0 %v1280_v30 }
 0x530   :  { %3248 = vmatmul.mubr.msk.f32.vlgmr.msra.gmra.mxu1 %vm771_vm2, %v1095_v5  ;;  %3236 = vmatprep.subr.mxu0 %v1432_v37 }
 0x531   :  { %3256 = vmatpush3.xpose.msk.msra.mxu1 %vm771_vm2, %v1676_v29  ;;  %3257 = vmatprep.mubr.msk.f32.mxu1 %vm3583_vm1, %v3582_v2 }
 0x532   :  { %3265 = vmatprep.subr.mxu1 %v3582_v2  ;;  %v1596_v48 = vpop.permute.xlu0 %1595 }
 0x534   :  { %3258 = vmatmul.mubr.msk.f32.vlgmr.msra.gmra.mxu1 %vm771_vm2, %v1674_v31 }
 0x535   :  { %3267 = vmatprep.mubr.msk.f32.mxu1 %vm3583_vm1, %v3582_v2 }
 0x538   :  { %v3454_v35 = vpop.eup %3453 }
 0x539   :  { %v1277_v36 = vmul.f32 %v3454_v35, %v3450_v19 }
 0x53b   :  { %3229 = vmatmul.mubr.msk.f32.vlgmr.msra.gmra.mxu0 %vm924_vm3, %v1277_v36 }
 0x53c   :  { %3237 = vmatpush3.msra.mxu0 %v1432_v37 }
 0x53d   :  { %3238 = vmatprep.subr.mxu0 %v1431_v38 }
 0x53e   :  { %3239 = vmatpush3.msra.mxu0 %v1431_v38 }
 0x53f   :  { %3250 = vmatprep.subr.mxu0 %v3582_v2 }
 0x5eb   :  { %v1427_v39 = vpop.f32.mrf.mxu1 }
 0x5ed   :  { %v3235_v40 = vpop.f32.mrf.mxu1 }
 0x5f0   :  { %v3858_v41 = vpop.f32.mrf.mxu1 }
 0x5f2   :  { %v3860_v42 = vpop.f32.mrf.mxu1 }
 0x5f4   :  { %v1747_v43 = vpop.f32.mrf.mxu1 }
 0x5f5   :  { %v1754_v44 = vsel %vm924_vm3, %v1747_v43, -inf }
 0x5f6   :  { %1755 = vmax.xlane.f32.xlu1 %v1754_v44  ;;  %v3259_v45 = vpop.f32.mrf.mxu1 }
 0x5fb   :  { %v1351_v46 = vpop.f32.mrf.mxu0 }
 0x5fc   :  { %3240 = vmatprep.mubr.msk.f32.mxu0 %vm771_vm2, %v1351_v46 }
 0x5fd   :  { %v3230_v47 = vpop.f32.mrf.mxu0  ;;  %3241 = vmatmul.mubr.msk.f32.vlgmr.msra.gmra.mxu0 %vm771_vm2, %v1427_v39 }
 0x5fe   :  { %3251 = vmatpush3.xpose.msk.msra.mxu0 %vm771_vm2, %v1598_v23  ;;  %3252 = vmatprep.mubr.msk.f32.mxu0 %vm3583_vm1, %v3582_v2 }
 0x5ff   :  { %3260 = vmatprep.subr.mxu0 %v3582_v2 }
 0x601   :  { %3253 = vmatmul.mubr.msk.f32.vlgmr.msra.gmra.mxu0 %vm771_vm2, %v1596_v48 }
 0x602   :  { %3262 = vmatprep.mubr.msk.f32.mxu0 %vm3583_vm1, %v3582_v2 }
 0x607   :  { %1849 = vrot.lane.b32.xlu1 %v3774_v33, %s3587_s28 }
 0x60b   :  { %2012 = vrot.lane.b32.xlu1 %v3767_v27, %s3588_s29 }
 0x60f   :  { %2090 = vrot.lane.b32.xlu1 %v3774_v33, %s3588_s29 }
 0x613   :  { %2088 = vrot.lane.b32.xlu1 %v3782_v34, %s3588_s29 }
 0x67f   :  { %v1756_v49 = vpop.xlane.xlu1 %1755 }
 0x680   :  { %v1758_v51 = vsub.f32 %v1747_v43, %v1756_v49 }
 0x682   :  { %v1761_v52 = vmul.f32 1.442695, %v1758_v51 }
 0x683   :  { %v1850_v50 = vpop.permute.xlu1 %1849 }
 0x684   :  { %3266 = vmatpush3.msra.mxu1 %v1850_v50  ;;  %3455 = vpow2.f32 %v1761_v52  ;;  %v2341_v50 = vld [vmem:[%s4146_s1 + $0x38] sm:$0xff] }
 0x685   :  { %3277 = vmatprep.subr.mxu1 %v3582_v2 }
 0x687   :  { %v2013_v4 = vpop.permute.xlu1 %2012 }
 0x68b   :  { %v2091_v16 = vpop.permute.xlu1 %2090 }
 0x68f   :  { %v2089_v19 = vpop.permute.xlu1 %2088 }
 0x691   :  { %v3456_v57 = vpop.eup %3455 }
 0x692   :  { %v1766_v34 = vsel %vm924_vm3, %v3456_v57, 0.0 }
 0x6bd   :  { %v3881_v53 = vpop.f32.mrf.mxu0 }
 0x6be   :  { %v1592_v25 = vadd.f32 %v3858_v41, %v3881_v53 }
 0x6bf   :  { %v3883_v54 = vpop.f32.mrf.mxu0 }
 0x6c0   :  { %v1587_v28 = vadd.f32 %v3860_v42, %v3883_v54 }
 0x6c1   :  { %v1669_v55 = vpop.f32.mrf.mxu0 }
 0x6c2   :  { %v1751_v56 = vsel %vm924_vm3, %v1669_v55, -inf }
 0x6c3   :  { %1752 = vmax.xlane.f32.xlu0 %v1751_v56  ;;  %v3254_v58 = vpop.f32.mrf.mxu0  ;;  %v3007_v56 = vld [vmem:[%s4147_s6] ss:$0 sm:$0xff] }
 0x6c7   :  { %1767 = vadd.xlane.f32.xlu0 %v1766_v34 }
 0x74c   :  { %v1753_v59 = vpop.xlane.xlu0 %1752 }
 0x74d   :  { %v1757_v60 = vsub.f32 %v1669_v55, %v1753_v59 }
 0x74f   :  { %v1759_v61 = vmul.f32 1.442695, %v1757_v60 }
 0x750   :  { %v1768_v62 = vpop.xlane.xlu0 %1767 }
 0x751   :  { %3457 = vpow2.f32 %v1759_v61  ;;  %v3943_v61 = vld [vmem:[#allocation4 + $0x8] sm:$0xff] }
 0x752   :  { %3459 = vrcp.f32 %v1768_v62 }
 0x75e   :  { %v3458_v63 = vpop.eup %3457 }
 0x75f   :  { %v3460_v0 = vpop.eup %3459  ;;  %v1763_v1 = vsel %vm924_vm3, %v3458_v63, 0.0 }
 0x760   :  { %1764 = vadd.xlane.f32.xlu0 %v1763_v1  ;;  %v1772_v3 = vmul.f32 %v3460_v0, %v3456_v57  ;;  %v3947_v0 = vld [vmem:[#allocation4] sm:$0xff] }
 0x762   :  { %3268 = vmatmul.mubr.msk.f32.vlgmr.msra.gmra.mxu1 %vm924_vm3, %v1772_v3 }
 0x763   :  { %3278 = vmatpush3.xpose.msk.msra.mxu1 %vm771_vm2, %v2013_v4  ;;  %3279 = vmatprep.mubr.msk.f32.mxu1 %vm3583_vm1, %v3582_v2 }
 0x764   :  { %3287 = vmatprep.subr.mxu1 %v3582_v2 }
 0x776   :  { %1773 = vrot.lane.b32.xlu0 %v3767_v27, %s3587_s28 }
 0x77a   :  { %2010 = vrot.lane.b32.xlu0 %v3771_v32, %s3588_s29  ;;  %v1926_v32 = vld [vmem:[%s4146_s1 + $0x28] sm:$0xff] }
 0x7e9   :  { %v1765_v5 = vpop.xlane.xlu0 %1764 }
 0x7ea   :  { %3461 = vrcp.f32 %v1765_v5 }
 0x7ed   :  { %v1774_v6 = vpop.permute.xlu0 %1773 }
 0x7ee   :  { %3261 = vmatpush3.msra.mxu0 %v1774_v6 }
 0x7ef   :  { %3270 = vmatprep.subr.mxu0 %v1926_v32 }
 0x7f1   :  { %v2011_v7 = vpop.permute.xlu0 %2010 }
 0x7f2   :  { %3280 = vmatmul.mubr.msk.f32.vlgmr.msra.gmra.mxu1 %vm771_vm2, %v2011_v7 }
 0x7f3   :  { %3289 = vmatprep.mubr.msk.f32.mxu1 %vm3583_vm1, %v3582_v2 }
 0x7f7   :  { %v3462_v8 = vpop.eup %3461 }
 0x7f8   :  { %v1771_v9 = vmul.f32 %v3462_v8, %v3458_v63 }
 0x7fa   :  { %3263 = vmatmul.mubr.msk.f32.vlgmr.msra.gmra.mxu0 %vm924_vm3, %v1771_v9 }
 0x7fb   :  { %3271 = vmatpush3.msra.mxu0 %v1926_v32 }
 0x7fc   :  { %3272 = vmatprep.subr.mxu0 %v1925_v12 }
 0x7fd   :  { %3273 = vmatpush3.msra.mxu0 %v1925_v12 }
 0x7fe   :  { %3282 = vmatprep.subr.mxu0 %v3582_v2 }
 0x822   :  { %v1921_v10 = vpop.f32.mrf.mxu1 }
 0x824   :  { %v3269_v11 = vpop.f32.mrf.mxu1 }
 0x8b2   :  { %v2084_v13 = vpop.f32.mrf.mxu1 }
 0x8b3   :  { %v2166_v14 = vsel %vm924_vm3, %v2084_v13, -inf }
 0x8b4   :  { %2167 = vmax.xlane.f32.xlu0 %v2166_v14  ;;  %v3281_v15 = vpop.f32.mrf.mxu1  ;;  %v2487_v14 = vld [vmem:[%s4122_s16 + $0x30] sm:$0xff] }
 0x8b5   :  { %v2682_v15 = vld [vmem:[%s4116_s10 + $0x78] sm:$0xff] }
 0x8ba   :  { %v1845_v17 = vpop.f32.mrf.mxu0 }
 0x8bb   :  { %3274 = vmatprep.mubr.msk.f32.mxu0 %vm771_vm2, %v1845_v17  ;;  %v2486_v17 = vld [vmem:[%s4122_s16 + $0x28] sm:$0xff] }
 0x8bc   :  { %v3264_v18 = vpop.f32.mrf.mxu0  ;;  %3275 = vmatmul.mubr.msk.f32.vlgmr.msra.gmra.mxu0 %vm771_vm2, %v1921_v10 }
 0x8bd   :  { %3283 = vmatpush3.xpose.msk.msra.mxu0 %vm771_vm2, %v2091_v16  ;;  %3284 = vmatprep.mubr.msk.f32.mxu0 %vm3583_vm1, %v3582_v2  ;;  %v2681_v16 = vld [vmem:[%s4116_s10 + $0x70] sm:$0xff]  ;;  %v2680_v18 = vld [vmem:[%s4116_s10 + $0x68] sm:$0xff] }
 0x8be   :  { %3292 = vmatprep.subr.mxu0 %v3582_v2 }
 0x8c0   :  { %3285 = vmatmul.mubr.msk.f32.vlgmr.msra.gmra.mxu0 %vm771_vm2, %v2089_v19  ;;  %v2485_v19 = vld [vmem:[%s4122_s16 + $0x20] sm:$0xff] }
 0x8c1   :  { %3294 = vmatprep.mubr.msk.f32.mxu0 %vm3583_vm1, %v3582_v2 }
 0x93d   :  { %v2168_v20 = vpop.xlane.xlu0 %2167 }
 0x93e   :  { %v2172_v21 = vsub.f32 %v2084_v13, %v2168_v20  ;;  %v2488_v13 = vld [vmem:[%s4122_s16 + $0x38] sm:$0xff]  ;;  %v2679_v20 = vld [vmem:[%s4116_s10 + $0x60] sm:$0xff] }
 0x940   :  { %v2174_v22 = vmul.f32 1.442695, %v2172_v21  ;;  %v2484_v21 = vld [vmem:[%s4122_s16 + $0x18] sm:$0xff] }
 0x942   :  { %3463 = vpow2.f32 %v2174_v22  ;;  %v2678_v22 = vld [vmem:[%s4116_s10 + $0x58] sm:$0xff] }
 0x94f   :  { %v3464_v23 = vpop.eup %3463 }
 0x950   :  { %v2178_v24 = vsel %vm924_vm3, %v3464_v23, 0.0 }
 0x951   :  { %2179 = vadd.xlane.f32.xlu0 %v2178_v24  ;;  %v2677_v24 = vld [vmem:[%s4116_s10 + $0x50] sm:$0xff] }
 0x97c   :  { %v3276_v26 = vpop.f32.mrf.mxu0 }
 0x97d   :  { %v2009_v29 = vadd.f32 %v3276_v26, %v1592_v25  ;;  %v2482_v25 = vld [vmem:[%s4122_s16 + $0x8] sm:$0xff] }
 0x97e   :  { %v1999_v30 = vpop.f32.mrf.mxu0  ;;  %v2676_v26 = vld [vmem:[%s4116_s10 + $0x48] sm:$0xff] }
 0x97f   :  { %v2008_v31 = vadd.f32 %v1999_v30, %v1587_v28  ;;  %v2481_v28 = vld [vmem:[%s4122_s16] sm:$0xff] }
 0x980   :  { %v2162_v35 = vpop.f32.mrf.mxu0 }
 0x981   :  { %v2169_v36 = vsel %vm924_vm3, %v2162_v35, -inf }
 0x982   :  { %2170 = vmax.xlane.f32.xlu1 %v2169_v36  ;;  %v3286_v37 = vpop.f32.mrf.mxu0 }
 0x993   :  { %2264 = vrot.lane.b32.xlu1 %v3774_v33, %s3589_s26 }
 0x9da   :  { %v2180_v44 = vpop.xlane.xlu0 %2179 }
 0xa0b   :  { %v2171_v38 = vpop.xlane.xlu1 %2170 }
 0xa0c   :  { %v2173_v39 = vsub.f32 %v2162_v35, %v2171_v38 }
 0xa0e   :  { %v2176_v40 = vmul.f32 1.442695, %v2173_v39  ;;  %v3008_v39 = vld [vmem:[%s4114_s8] ss:$0 sm:$0xff] }
 0xa0f   :  { %v2265_v43 = vpop.permute.xlu1 %2264 }
 0xa10   :  { %3465 = vpow2.f32 %v2176_v40  ;;  %3293 = vmatpush3.msra.mxu0 %v2265_v43 }
 0xa11   :  { %3467 = vrcp.f32 %v2180_v44  ;;  %3304 = vmatprep.subr.mxu0 %v2488_v13 }
 0xa1d   :  { %v3466_v41 = vpop.eup %3465 }
 0xa1e   :  { %v2181_v42 = vsel %vm924_vm3, %v3466_v41, 0.0  ;;  %v3468_v46 = vpop.eup %3467 }
 0xa1f   :  { %2182 = vadd.xlane.f32.xlu0 %v2181_v42  ;;  %v2186_v48 = vmul.f32 %v3468_v46, %v3464_v23  ;;  %v2483_v23 = vld [vmem:[%s4122_s16 + $0x10] sm:$0xff] }
 0xa35   :  { %2188 = vrot.lane.b32.xlu0 %v3767_v27, %s3589_s26  ;;  %v2340_v27 = vld [vmem:[%s4146_s1 + $0x30] sm:$0xff] }
 0xaa8   :  { %v2183_v45 = vpop.xlane.xlu0 %2182 }
 0xaa9   :  { %3469 = vrcp.f32 %v2183_v45 }
 0xaac   :  { %v2189_v47 = vpop.permute.xlu0 %2188 }
 0xaad   :  { %3288 = vmatpush3.msra.mxu1 %v2189_v47 }
 0xaae   :  { %3290 = vmatmul.mubr.msk.f32.vlgmr.msra.gmra.mxu1 %vm924_vm3, %v2186_v48  ;;  %3297 = vmatprep.subr.mxu1 %v2341_v50 }
 0xaaf   :  { %3298 = vmatpush3.msra.mxu1 %v2341_v50 }
 0xab0   :  { %3299 = vmatprep.subr.mxu1 %v2340_v27 }
 0xab1   :  { %3300 = vmatpush3.msra.mxu1 %v2340_v27  ;;  %v2673_v27 = vld [vmem:[%s4116_s10 + $0x30] sm:$0xff] }
 0xab2   :  { %3323 = vmatprep.subr.mxu1 %v3582_v2 }
 0xab6   :  { %v3470_v33 = vpop.eup %3469 }
 0xab7   :  { %v2187_v49 = vmul.f32 %v3470_v33, %v3466_v41  ;;  %v3009_v41 = vld [vmem:[%s4115_s9] ss:$0 sm:$0xff] }
 0xab9   :  { %3295 = vmatmul.mubr.msk.f32.vlgmr.msra.gmra.mxu0 %vm924_vm3, %v2187_v49  ;;  %v2674_v49 = vld [vmem:[%s4116_s10 + $0x38] sm:$0xff] }
 0xaba   :  { %3305 = vmatpush3.msra.mxu0 %v2488_v13 }
 0xabb   :  { %3306 = vmatprep.subr.mxu0 %v2487_v14 }
 0xabc   :  { %3307 = vmatpush3.msra.mxu0 %v2487_v14 }
 0xabd   :  { %3308 = vmatprep.subr.mxu0 %v2486_v17 }
 0xabe   :  { %3309 = vmatpush3.msra.mxu0 %v2486_v17 }
 0xabf   :  { %3310 = vmatprep.subr.mxu0 %v2485_v19 }
 0xac0   :  { %3311 = vmatpush3.msra.mxu0 %v2485_v19 }
 0xac1   :  { %3312 = vmatprep.subr.mxu0 %v2484_v21 }
 0xac2   :  { %3313 = vmatpush3.msra.mxu0 %v2484_v21 }
 0xac3   :  { %3314 = vmatprep.subr.mxu0 %v2483_v23 }
 0xac4   :  { %3315 = vmatpush3.msra.mxu0 %v2483_v23 }
 0xac5   :  { %3316 = vmatprep.subr.mxu0 %v2482_v25 }
 0xac6   :  { %3317 = vmatpush3.msra.mxu0 %v2482_v25 }
 0xac7   :  { %3318 = vmatprep.subr.mxu0 %v2481_v28 }
 0xac8   :  { %3319 = vmatpush3.msra.mxu0 %v2481_v28 }
 0xac9   :  { %3342 = vmatprep.subr.mxu0 %v3582_v2 }
 0xb6e   :  { %v2260_v51 = vpop.f32.mrf.mxu1 }
 0xb6f   :  { %3301 = vmatprep.mubr.msk.f32.mxu1 %vm771_vm2, %v2260_v51  ;;  %v2672_v51 = vld [vmem:[%s4116_s10 + $0x28] sm:$0xff] }
 0xb70   :  { %v3291_v52 = vpop.f32.mrf.mxu1 }
 0xb71   :  { %v2671_v52 = vld [vmem:[%s4116_s10 + $0x20] sm:$0xff] }
 0xb79   :  { %v2336_v53 = vpop.f32.mrf.mxu0 }
 0xb7a   :  { %3302 = vmatmul.mubr.msk.f32.vlgmr.msra.gmra.mxu1 %vm771_vm2, %v2336_v53  ;;  %v2670_v53 = vld [vmem:[%s4116_s10 + $0x18] sm:$0xff] }
 0xb7b   :  { %v3296_v54 = vpop.f32.mrf.mxu0  ;;  %3339 = vmatprep.mubr.msk.f32.mxu1 %vm3583_vm1, %v3582_v2  ;;  %3324 = vmatpush3.msra.mxu1 %v2682_v15 }
 0xb7c   :  { %3325 = vmatprep.subr.mxu1 %v3582_v2  ;;  %v2669_v54 = vld [vmem:[%s4116_s10 + $0x10] sm:$0xff] }
 0xb7d   :  { %3326 = vmatpush3.msra.mxu1 %v2681_v16 }
 0xb7e   :  { %3327 = vmatprep.subr.mxu1 %v3582_v2 }
 0xb7f   :  { %3328 = vmatpush3.msra.mxu1 %v2680_v18 }
 0xb80   :  { %3329 = vmatprep.subr.mxu1 %v3582_v2 }
 0xb81   :  { %3330 = vmatpush3.msra.mxu1 %v2679_v20 }
 0xb82   :  { %3331 = vmatprep.subr.mxu1 %v3582_v2 }
 0xb83   :  { %3332 = vmatpush3.msra.mxu1 %v2678_v22 }
 0xb84   :  { %3333 = vmatprep.subr.mxu1 %v3582_v2 }
 0xb85   :  { %3334 = vmatpush3.msra.mxu1 %v2677_v24 }
 0xb86   :  { %3335 = vmatprep.subr.mxu1 %v3582_v2 }
 0xb87   :  { %3336 = vmatpush3.msra.mxu1 %v2676_v26  ;;  %v3590_v26 = vmov 0  }
 0xb88   :  { %3337 = vmatprep.subr.mxu1 %v3582_v2  ;;  %3380 = vset.pattern.permute.xlu1 %v3590_v26 }
 0xb89   :  { %3381 = vset.pattern.permute.xlu0 %v3590_v26 }
 0xc3a   :  { %v3303_v55 = vpop.f32.mrf.mxu1 }
 0xc3b   :  { %v2424_v57 = vadd.f32 %v3303_v55, %v2009_v29  ;;  %v2675_v29 = vld [vmem:[%s4116_s10 + $0x40] sm:$0xff]  ;;  %v2757_v55 = vrot.slane %v3943_v61, 7 }
 0xc3c   :  { %v2414_v58 = vpop.f32.mrf.mxu1  ;;  %3338 = vmatpush3.msra.mxu1 %v2675_v29 }
 0xc3d   :  { %v2433_v34 = vadd.f32 %v3007_v56, %v2424_v57  ;;  %v2423_v59 = vadd.f32 %v2414_v58, %v2008_v31  ;;  %v2667_v57 = vld [vmem:[%s4116_s10] sm:$0xff]  ;;  %v2758_v58 = vsel %vm2662_vm4, %v2757_v55, %v3947_v0 }
 0xc3f   :  { %v2432_v60 = vadd.f32 %v3007_v56, %v2423_v59  ;;  %v2435_v62 = vadd.f32 %v3943_v61, %v2433_v34  ;;  %v2668_v56 = vld [vmem:[%s4116_s10 + $0x8] sm:$0xff] }
 0xc41   :  { %v2441_v63 = vsel %vm143_vm0, %v2435_v62, 0.0  ;;  %v2434_v1 = vadd.f32 %v3947_v0, %v2432_v60  ;;  %v3010_v60 = vld [vmem:[%s4123_s17] ss:$0 sm:$0xff] }
 0xc42   :  { %2442 = vadd.xlane.f32.xlu0 %v2441_v63 }
 0xc43   :  { %v2438_v3 = vsel %vm143_vm0, %v2434_v1, 0.0 }
 0xc44   :  { %2439 = vadd.xlane.f32.xlu1 %v2438_v3 }
 0xccb   :  { %v2443_v4 = vpop.xlane.xlu0 %2442 }
 0xccc   :  { %v2446_v5 = vmul.f32 0.015625, %v2443_v4 }
 0xccd   :  { %v2440_v6 = vpop.xlane.xlu1 %2439 }
 0xcce   :  { %v3951_v7 = vsub.f32 %v2435_v62, %v2446_v5  ;;  %v2445_v8 = vmul.f32 0.015625, %v2440_v6 }
 0xcd0   :  { %v3953_v9 = vsub.f32 %v2434_v1, %v2445_v8  ;;  %v2450_v10 = vmul.f32 %v3951_v7, %v3951_v7  ;;  %v2466_v40 = vmul.f32 %v3008_v39, %v3951_v7 }
 0xcd2   :  { %v2454_v11 = vsel %vm143_vm0, %v2450_v10, 0.0  ;;  %v2449_v32 = vmul.f32 %v3953_v9, %v3953_v9  ;;  %v2465_v42 = vmul.f32 %v3008_v39, %v3953_v9  ;;  %v3014_v39 = vld [vmem:[%s4125_s19] ss:$0 sm:$0xff] }
 0xcd3   :  { %2455 = vadd.xlane.f32.xlu1 %v2454_v11 }
 0xcd4   :  { %v2451_v12 = vsel %vm143_vm0, %v2449_v32, 0.0 }
 0xcd5   :  { %2452 = vadd.xlane.f32.xlu0 %v2451_v12 }
 0xd5c   :  { %v2456_v30 = vpop.xlane.xlu1 %2455 }
 0xd5d   :  { %v2458_v31 = vmul.f32 0.015625, %v2456_v30 }
 0xd5e   :  { %v2453_v35 = vpop.xlane.xlu0 %2452 }
 0xd5f   :  { %v2468_v36 = vadd.f32 1e-12, %v2458_v31  ;;  %v2457_v37 = vmul.f32 0.015625, %v2453_v35  ;;  %v3013_v31 = vld [vmem:[%s4124_s18] ss:$0 sm:$0xff] }
 0xd61   :  { %3471 = vrsqrt.f32 %v2468_v36  ;;  %v2467_v38 = vadd.f32 1e-12, %v2457_v37 }
 0xd63   :  { %3473 = vrsqrt.f32 %v2467_v38 }
 0xd6e   :  { %v3472_v43 = vpop.eup %3471 }
 0xd6f   :  { %v2472_v44 = vmul.f32 %v3472_v43, %v2466_v40 }
 0xd70   :  { %v3474_v45 = vpop.eup %3473 }
 0xd71   :  { %v2471_v46 = vmul.f32 %v3474_v45, %v2465_v42  ;;  %v2480_v47 = vadd.f32 %v3009_v41, %v2472_v44  ;;  %v3015_v42 = vld [vmem:[%s4126_s20] ss:$0 sm:$0xff] }
 0xd73   :  { %v2479_v48 = vadd.f32 %v3009_v41, %v2471_v46  ;;  %v2683_v33 = vrot.slane %v2480_v47, 7 }
 0xd75   :  { %3320 = vmatprep.mubr.msk.f32.mxu0 %vm143_vm0, %v2479_v48  ;;  %v2684_v50 = vsel %vm2662_vm4, %v2683_v33, %v2479_v48  ;;  %v3020_v33 = vld [vmem:[%s4118_s12] ss:$0 sm:$0xff]  ;;  %s3591_s12 = smov [#allocation10]  }
 0xd76   :  { %3321 = vmatmul.mubr.msk.f32.vlgmr.msra.gmra.mxu0 %vm143_vm0, %v2480_v47  ;;  %3340 = vmatmul.mubr.msk.f32.vlgmr.msra.gmra.mxu1 %vm143_vm0, %v2684_v50 }
 0xd77   :  { %3343 = vmatpush3.msra.mxu0 %v2674_v49  ;;  %3358 = vmatprep.mubr.msk.f32.mxu0 %vm3583_vm1, %v3582_v2 }
 0xd78   :  { %3344 = vmatprep.subr.mxu0 %v3582_v2 }
 0xd79   :  { %3345 = vmatpush3.msra.mxu0 %v2673_v27  ;;  %v3021_v27 = vld [vmem:[%s4119_s13] ss:$0 sm:$0xff]  ;;  %s2903_s13 = sshll.u32 %s3591_s12, 4  ;;  %s2904_s13 = int_to_ptr.vmem [resolvable:$true] %s2903_s13 }
 0xd7a   :  { %3346 = vmatprep.subr.mxu0 %v3582_v2  ;;  %p3552_p2 = scmp.lt.s32.totalorder %s2904_s13, %s2904_s13 }
 0xd7b   :  { %3347 = vmatpush3.msra.mxu0 %v2672_v51 }
 0xd7c   :  { %3348 = vmatprep.subr.mxu0 %v3582_v2 }
 0xd7d   :  { %3349 = vmatpush3.msra.mxu0 %v2671_v52  ;;  %v3022_v52 = vld [vmem:[%s4120_s14] ss:$0 sm:$0xff]  ;;  %s3547_s14 = scalar_lea.vmem %s2904_s13, 32 }
 0xd7e   :  { %3350 = vmatprep.subr.mxu0 %v3582_v2  ;;  %p3548_p1 = scmp.ne.s32.totalorder %s2904_s13, %s3547_s14  ;;  %p3553_p3 = scmp.lt.s32.totalorder %s3547_s14, %s3547_s14 }
 0xd7f   :  { %3351 = vmatpush3.msra.mxu0 %v2670_v53 }
 0xd80   :  { %3352 = vmatprep.subr.mxu0 %v3582_v2  ;;  %p3554_p4 = por %p3553_p3, %p3552_p2 }
 0xd81   :  { %3353 = vmatpush3.msra.mxu0 %v2669_v54 }
 0xd82   :  { %3354 = vmatprep.subr.mxu0 %v3582_v2  ;;  %p3555_p5 = pnand %p3554_p4, %p3548_p1 }
 0xd83   :  { %3355 = vmatpush3.msra.mxu0 %v2668_v56 }
 0xd84   :  { %3356 = vmatprep.subr.mxu0 %v3582_v2  ;;  %v3019_v2 = vld [vmem:[%s4117_s11] ss:$0 sm:$0xff] }
 0xd85   :  { %3357 = vmatpush3.msra.mxu0 %v2667_v57 }
 0xd86   :  { %3359 = vmatmul.mubr.msk.f32.vlgmr.msra.gmra.mxu0 %vm143_vm0, %v2758_v58  ;;  %v3016_v58 = vld [vmem:[#allocation3] ss:$0 sm:$0xff] }
 0xe36   :  { %v3322_v34 = vpop.f32.mrf.mxu0  ;;  %v2753_v59 = vpop.f32.mrf.mxu1 }
 0xe37   :  { %v2574_v6 = vadd.f32 %v3322_v34, %v3010_v60 }
 0xe38   :  { %v2568_v61 = vpop.f32.mrf.mxu0  ;;  %v3341_v62 = vpop.f32.mrf.mxu1 }
 0xe39   :  { %v2569_v63 = vadd.f32 %v3010_v60, %v2568_v61  ;;  %v2578_v9 = vmax.f32 %v2574_v6, 0.0 }
 0xe3b   :  { %v2577_v1 = vmax.f32 %v2569_v63, 0.0  ;;  %v2584_v11 = vsel %vm143_vm0, %v2578_v9, 0.0  ;;  %v2652_v63 = vlaneseq }
 0xe3d   :  { %v2581_v3 = vsel %vm143_vm0, %v2577_v1, 0.0 }
 0xe3e   :  { %2582 = vadd.xlane.f32.xlu1 %v2581_v3  ;;  %v2653_v3 = vand.u32 127, %v2652_v63 }
 0xe46   :  { %v2827_v4 = vpop.f32.mrf.mxu0 }
 0xe47   :  { %v2828_v0 = vadd.f32 %v2827_v4, %v2753_v59  ;;  %v2655_v4 = vshrl.u32 %v2652_v63, 7 }
 0xe48   :  { %v3360_v5 = vpop.f32.mrf.mxu0 }
 0xe49   :  { %v2838_v7 = vadd.f32 %v3019_v2, %v2828_v0  ;;  %v2656_v6 = vsub.s32 %v2653_v3, %v2655_v4 }
 0xe4b   :  { %v2839_v8 = vmax.f32 %v2838_v7, 0.0 }
 0xe4d   :  { %v2843_v10 = vsel %vm2842_vm5, %v2839_v8, 0.0 }
 0xe4e   :  { %2844 = vadd.xlane.f32.xlu0 %v2843_v10 }
 0xe52   :  { %2585 = vadd.xlane.f32.xlu0 %v2584_v11 }
 0xec7   :  { %v2583_v32 = vpop.xlane.xlu1 %2582 }
 0xec8   :  { %v2587_v12 = vmul.f32 0.015625, %v2583_v32 }
 0xeca   :  { %v2589_v13 = vsub.f32 %v2577_v1, %v2587_v12  ;;  %v3023_v1 = vld [vmem:[#allocation2] ss:$0 sm:$0xff] }
 0xecc   :  { %v2591_v14 = vmul.f32 %v2589_v13, %v2589_v13  ;;  %v2607_v36 = vmul.f32 %v3013_v31, %v2589_v13 }
 0xece   :  { %v2593_v15 = vsel %vm143_vm0, %v2591_v14, 0.0 }
 0xecf   :  { %2594 = vadd.xlane.f32.xlu0 %v2593_v15 }
 0xed7   :  { %v2845_v16 = vpop.xlane.xlu0 %2844 }
 0xed8   :  { %v2846_v17 = vmul.f32 0.015625, %v2845_v16 }
 0xeda   :  { %v2847_v18 = vsub.f32 %v2839_v8, %v2846_v17 }
 0xedb   :  { %v2586_v19 = vpop.xlane.xlu0 %2585 }
 0xedc   :  { %v2588_v20 = vmul.f32 0.015625, %v2586_v19  ;;  %v2848_v21 = vmul.f32 %v2847_v18, %v2847_v18  ;;  %v2859_v49 = vmul.f32 %v3020_v33, %v2847_v18 }
 0xede   :  { %v2590_v22 = vsub.f32 %v2578_v9, %v2588_v20  ;;  %v2849_v23 = vsel %vm2842_vm5, %v2848_v21, 0.0 }
 0xedf   :  { %2850 = vadd.xlane.f32.xlu1 %v2849_v23 }
 0xee0   :  { %v2592_v24 = vmul.f32 %v2590_v22, %v2590_v22  ;;  %v2608_v53 = vmul.f32 %v3013_v31, %v2590_v22 }
 0xee2   :  { %v2596_v25 = vsel %vm143_vm0, %v2592_v24, 0.0 }
 0xee3   :  { %2597 = vadd.xlane.f32.xlu1 %v2596_v25 }
 0xf58   :  { %v2595_v28 = vpop.xlane.xlu0 %2594 }
 0xf59   :  { %v2599_v29 = vmul.f32 0.015625, %v2595_v28 }
 0xf5b   :  { %v2609_v30 = vadd.f32 1e-12, %v2599_v29 }
 0xf5d   :  { %3475 = vrsqrt.f32 %v2609_v30 }
 0xf68   :  { %v2851_v35 = vpop.xlane.xlu1 %2850 }
 0xf69   :  { %v2852_v37 = vmul.f32 0.015625, %v2851_v35 }
 0xf6a   :  { %v3476_v38 = vpop.eup %3475 }
 0xf6b   :  { %v2860_v40 = vadd.f32 1e-12, %v2852_v37  ;;  %v2613_v43 = vmul.f32 %v3476_v38, %v2607_v36 }
 0xf6c   :  { %v2598_v41 = vpop.xlane.xlu1 %2597 }
 0xf6d   :  { %3477 = vrsqrt.f32 %v2860_v40  ;;  %v2600_v44 = vmul.f32 0.015625, %v2598_v41  ;;  %v2621_v45 = vadd.f32 %v3014_v39, %v2613_v43 }
 0xf6f   :  { %v2610_v46 = vadd.f32 1e-12, %v2600_v44  ;;  %v2630_v47 = vmul.f32 %v3015_v42, %v2621_v45 }
 0xf71   :  { %3479 = vrsqrt.f32 %v2610_v46  ;;  %v2632_v48 = vsel %vm143_vm0, %v2630_v47, 0.0 }
 0xf72   :  { %2633 = vadd.xlane.f32.xlu1 %v2632_v48 }
 0xf7a   :  { %v3478_v50 = vpop.eup %3477 }
 0xf7b   :  { %v2862_v51 = vmul.f32 %v3478_v50, %v2859_v49 }
 0xf7d   :  { %v2869_v54 = vadd.f32 %v3021_v27, %v2862_v51 }
 0xf7e   :  { %v3480_v55 = vpop.eup %3479 }
 0xf7f   :  { %v2877_v56 = vmul.f32 %v3022_v52, %v2869_v54  ;;  %v2614_v57 = vmul.f32 %v3480_v55, %v2608_v53 }
 0xf81   :  { %v2878_v34 = vsel %vm2842_vm5, %v2877_v56, 0.0  ;;  %v2622_v59 = vadd.f32 %v3014_v39, %v2614_v57 }
 0xf82   :  { %2879 = vadd.xlane.f32.xlu0 %v2878_v34 }
 0xf83   :  { %2645 = vperm.xlu1 %3380, %v3016_v58   ;;  %v2631_v60 = vmul.f32 %v3015_v42, %v2622_v59 }
 0xf85   :  { %v2635_v61 = vsel %vm143_vm0, %v2631_v60, 0.0 }
 0xf86   :  { %2636 = vadd.xlane.f32.xlu0 %v2635_v61 }
 0xffb   :  { %v2634_v62 = vpop.xlane.xlu1 %2633 }
 0xfff   :  { %v2646_v2 = vpop.permute.xlu1 %2645 }
0x1000   :  { %v2648_v7 = vadd.f32 %v2646_v2, %v2634_v62 }
0x1002   :  { %v2657_v11 = vrot.slane %v2648_v7, %v2656_v6 }
0x100b   :  { %v2880_v0 = vpop.xlane.xlu0 %2879 }
0x100c   :  { %v2888_v5 = vadd.f32 %v3023_v1, %v2880_v0 }
0x100e   :  { %v3024_v8 = vmul.f32 -1.442695, %v2888_v5 }
0x100f   :  { %v2637_v9 = vpop.xlane.xlu0 %2636 }
0x1010   :  { %3481 = vpow2.f32 %v3024_v8  ;;  %v2649_v10 = vadd.f32 %v2646_v2, %v2637_v9 }
0x1012   :  { %v2661_v32 = vrot.slane %v2649_v10, %v2656_v6 }
0x1014   :  { %v2663_v12 = vsel %vm2662_vm4, %v2661_v32, %v2657_v11 }
0x1015   :  { %2666 = vst.msk [vmem:[#allocation10] sm:$0x3] %vm2665_vm6, %v2663_v12 }
0x1016   :  { %3558 = shalt.err (!%p3555_p5)
}
0x1017   :  { %2906 = dma.vmem_to_hbm [thread:$0]  %s2904_s13, 32, %s4127_s22, [#allocation6]   ;;  %vm2895_vm7 = vcmask 1024  }
0x101d   :  { %v3482_v13 = vpop.eup %3481 }
0x101e   :  { %v2892_v14 = vadd.f32 1.0, %v3482_v13 }
0x1020   :  { %3483 = vrcp.f32 %v2892_v14 }
0x102d   :  { %v3484_v15 = vpop.eup %3483 }
0x102e   :  { %2896 = vst.msk [vmem:[%s4128_s23] sm:$0x3] %vm2895_vm7, %v3484_v15 }
0x102f   :  { %3571 = dma.done.wait [#allocation6], 32  }
0x1030   :  { %3572 = vsyncadd [#allocation6], 4294967264 }
0x1031   :  { %2914 = vsyncpa [#allocation5], 1 }
0x1032   :  { %2915 = vsyncpa [#allocation8], 1 }
0x1033   :  { %2916 = vsyncpa [#allocation6], 1 }

</bundles_post_ra>
